<compile_context>
chip_gen: v5e
topology: v5e:2x2
jax: 0.10.0
libtpu: 0.0.40
codegen_flags: <defaults>
</compile_context>

<pallas_src>
import jax
import jax.numpy as jnp
from jax import lax
from jax.experimental import pallas as pl
from jax.experimental.pallas import tpu as pltpu


def _aligned(idx, align):
    # pl.multiple_of alignment hint is only needed for traced (dynamic) indices.
    return idx if isinstance(idx, int) else pl.multiple_of(idx, align)


# --------------------- fused BiLSTM + classifier kernel ----------------------
def _bilstm_fused_kernel(x_ref, wih_ref, whh_ref, b_ref, h0_ref, c0_ref,
                         wfc_ref, bfc_ref,
                         logp_ref, hn_ref, cn_ref,
                         gx_sc):
    TB = x_ref.shape[0]
    _, B, H = h0_ref.shape
    T = TB // B
    H4 = 4 * H

    # ---- fused input projection for BOTH directions (one MXU pass over x) ----
    # cols [:4H] = fwd gate pre-activations (i,f,g,o), cols [4H:] = bwd gates.
    gx_sc[...] = (jnp.dot(x_ref[...], wih_ref[...],
                          preferred_element_type=jnp.float32) + b_ref[...])

    whh_block = whh_ref[...]                        # (2H, 8H) block-diagonal
    wfc = wfc_ref[...]                              # (2H, C)

    h_cat0 = jnp.concatenate([h0_ref[0], h0_ref[1]], axis=-1)   # (B, 2H)
    c_f0 = c0_ref[0]
    c_b0 = c0_ref[1]

    def step(t, carry):
        h_cat, c_f, c_b = carry
        row_f = _aligned(t * B, B)                  # fwd consumes position t
        row_b = _aligned((T - 1 - t) * B, B)        # bwd consumes position T-1-t

        # One block-diagonal hidden matmul covers both directions.
        hh = jnp.dot(h_cat, whh_block, preferred_element_type=jnp.float32)  # (B,8H)
        gates_f = hh[:, :H4] + gx_sc[pl.ds(row_f, B), :H4]
        gates_b = hh[:, H4:] + gx_sc[pl.ds(row_b, B), H4:]

        # Full-width sigmoid (4H lanes), tanh only on the g-gate slice.
        sig_f = jax.nn.sigmoid(gates_f)
        sig_b = jax.nn.sigmoid(gates_b)
        g_f = jnp.tanh(gates_f[:, 2 * H:3 * H])
        g_b = jnp.tanh(gates_b[:, 2 * H:3 * H])

        c_f_new = sig_f[:, H:2 * H] * c_f + sig_f[:, :H] * g_f
        c_b_new = sig_b[:, H:2 * H] * c_b + sig_b[:, :H] * g_b
        h_f_new = sig_f[:, 3 * H:] * jnp.tanh(c_f_new)
        h_b_new = sig_b[:, 3 * H:] * jnp.tanh(c_b_new)
        return (jnp.concatenate([h_f_new, h_b_new], axis=-1), c_f_new, c_b_new)

    # Peel t == 0: the backward state after its first step IS the backward
    # hidden at sequence position T-1 (what out[:, -1, H:] consumes).
    h_cat, c_f, c_b = step(0, (h_cat0, c_f0, c_b0))
    h_b_last = h_cat[:, H:]

    unroll = True if T <= 32 else 8
    h_cat, c_f, c_b = lax.fori_loop(1, T, step, (h_cat, c_f, c_b), unroll=unroll)

    h_f_final = h_cat[:, :H]
    h_b_final = h_cat[:, H:]

    # Classifier without a lane concat: split the FC weight by direction.
    logits = (jnp.dot(h_f_final, wfc[:H], preferred_element_type=jnp.float32)
              + jnp.dot(h_b_last, wfc[H:], preferred_element_type=jnp.float32)
              + bfc_ref[...])                                     # (B, C)
    m = jnp.max(logits, axis=1, keepdims=True)
    z = logits - m
    lse = jnp.log(jnp.sum(jnp.exp(z), axis=1, keepdims=True))
    logp_ref[...] = z - lse

    hn_ref[0] = h_f_final
    hn_ref[1] = h_b_final
    cn_ref[0] = c_f
    cn_ref[1] = c_b


def bilstm_fused(x_flat, wih_cat, whh_block, b_cat, h0, c0, wfc_t, bfc):
    """x_flat: (T*B, E) time-major-flattened embeddings; h0/c0: (2, B, H)."""
    TB, E = x_flat.shape
    _, B, H = h0.shape
    C = wfc_t.shape[-1]

    def full(shape):
        return pl.BlockSpec(shape, lambda i, shape=shape: (0,) * len(shape))

    # TODO(synk): with grid=(1,) the default double-buffering of these small
    # resident inputs is harmless; at production sizes use Buffered(1) / T-tiling.
    return pl.pallas_call(
        _bilstm_fused_kernel,
        out_shape=(
            jax.ShapeDtypeStruct((B, C), jnp.float32),      # log-probs
            jax.ShapeDtypeStruct((2, B, H), jnp.float32),   # h_n
            jax.ShapeDtypeStruct((2, B, H), jnp.float32),   # c_n
        ),
        grid_spec=pltpu.PrefetchScalarGridSpec(
            num_scalar_prefetch=0,
            grid=(1,),
            in_specs=[
                full((TB, E)),                                    # embedded seq
                full((E, 8 * H)),                                 # fused W_ih
                full((2 * H, 8 * H)),                             # block-diag W_hh
                full((1, 8 * H)),                                 # fused bias
                full((2, B, H)), full((2, B, H)),                 # h0, c0
                full((2 * H, C)), full((1, C)),                   # classifier
            ],
            out_specs=[
                full((B, C)), full((2, B, H)), full((2, B, H)),
            ],
            scratch_shapes=[
                pltpu.VMEM((TB, 8 * H), jnp.float32),   # fused input projections
            ],
        ),
        compiler_params=pltpu.CompilerParams(
            dimension_semantics=("arbitrary",)),
    )(x_flat, wih_cat, whh_block, b_cat, h0, c0, wfc_t, bfc)


# ------------------------------ model wrapper --------------------------------
def init_params(key, vocab_size, embedding_dim, hidden_dim, num_classes):
    keys = jax.random.split(key, 12)
    s_h = 1.0 / jnp.sqrt(hidden_dim)
    s_fc = 1.0 / jnp.sqrt(2 * hidden_dim)

    def u(k, shape, s):
        return jax.random.uniform(k, shape, jnp.float32, -s, s)

    return {
        "embedding": jax.random.normal(keys[0], (vocab_size, embedding_dim),
                                       jnp.float32),
        # forward direction
        "w_ih_f": u(keys[1], (4 * hidden_dim, embedding_dim), s_h),
        "w_hh_f": u(keys[2], (4 * hidden_dim, hidden_dim), s_h),
        "b_ih_f": u(keys[3], (4 * hidden_dim,), s_h),
        "b_hh_f": u(keys[4], (4 * hidden_dim,), s_h),
        # backward direction
        "w_ih_b": u(keys[5], (4 * hidden_dim, embedding_dim), s_h),
        "w_hh_b": u(keys[6], (4 * hidden_dim, hidden_dim), s_h),
        "b_ih_b": u(keys[7], (4 * hidden_dim,), s_h),
        "b_hh_b": u(keys[8], (4 * hidden_dim,), s_h),
        # classifier
        "w_fc": u(keys[9], (num_classes, 2 * hidden_dim), s_fc),
        "b_fc": u(keys[10], (num_classes,), s_fc),
    }


@jax.jit
def bilstm_forward(params, tokens, hidden):
    """tokens: (B, T) int32; hidden: (h0, c0) each (2, B, H)."""
    h0_all, c0_all = hidden
    B, T = tokens.shape
    H = h0_all.shape[-1]

    # Embedding lookup (gather) — glue in plain JAX.
    embedded = jnp.take(params["embedding"], tokens, axis=0)       # (B, T, E)

    # Keep batch a multiple of 8 (f32 sublane count) so per-step gx slices in
    # the kernel remain sublane aligned.
    B_pad = ((B + 7) // 8) * 8
    if B_pad != B:
        pad = B_pad - B
        embedded = jnp.pad(embedded, ((0, pad), (0, 0), (0, 0)))
        h0_all = jnp.pad(h0_all, ((0, 0), (0, pad), (0, 0)))
        c0_all = jnp.pad(c0_all, ((0, 0), (0, pad), (0, 0)))

    x_flat = jnp.transpose(embedded, (1, 0, 2)).reshape(T * B_pad, -1)  # (T*B,E)

    # Fused / rearranged weights (tiny one-time plain-JAX cost per call).
    # TODO(synk): bf16 operand cast for v6e/v7x MXU (keep f32 accumulation).
    wih_cat = jnp.concatenate([params["w_ih_f"].T, params["w_ih_b"].T],
                              axis=1)                                   # (E, 8H)
    b_cat = jnp.concatenate([params["b_ih_f"] + params["b_hh_f"],
                             params["b_ih_b"] + params["b_hh_b"]]
                            ).reshape(1, -1)                            # (1, 8H)
    zeros = jnp.zeros((H, 4 * H), jnp.float32)
    whh_block = jnp.concatenate(
        [jnp.concatenate([params["w_hh_f"].T, zeros], axis=1),
         jnp.concatenate([zeros, params["w_hh_b"].T], axis=1)],
        axis=0)                                                         # (2H, 8H)

    log_probs, h_n, c_n = bilstm_fused(
        x_flat, wih_cat, whh_block, b_cat, h0_all, c0_all,
        params["w_fc"].T, params["b_fc"].reshape(1, -1))

    if B_pad != B:
        log_probs = log_probs[:B]
        h_n = h_n[:, :B]
        c_n = c_n[:, :B]
    return log_probs, (h_n, c_n)


def init_hidden(lstm_layers, num_directions, batch_size, hidden_dim):
    shape = (lstm_layers * num_directions, batch_size, hidden_dim)
    return (jnp.zeros(shape, jnp.float32), jnp.zeros(shape, jnp.float32))


# ----------------------------- pure-JAX reference ----------------------------
def _reference_forward(params, tokens, hidden):
    h0_all, c0_all = hidden
    emb = jnp.take(params["embedding"], tokens, axis=0)            # (B, T, E)
    _, T, _ = emb.shape
    H = h0_all.shape[-1]

    def cell(x_t, h, c, w_ih, w_hh, b):
        gates = x_t @ w_ih.T + h @ w_hh.T + b
        i = jax.nn.sigmoid(gates[:, 0 * H:1 * H])
        f = jax.nn.sigmoid(gates[:, 1 * H:2 * H])
        g = jnp.tanh(gates[:, 2 * H:3 * H])
        o = jax.nn.sigmoid(gates[:, 3 * H:4 * H])
        c = f * c + i * g
        h = o * jnp.tanh(c)
        return h, c

    # forward direction
    h, c = h0_all[0], c0_all[0]
    b_f = params["b_ih_f"] + params["b_hh_f"]
    for t in range(T):
        h, c = cell(emb[:, t], h, c, params["w_ih_f"], params["w_hh_f"], b_f)
    h_f_last, c_f_last = h, c
    # backward direction
    h, c = h0_all[1], c0_all[1]
    b_b = params["b_ih_b"] + params["b_hh_b"]
    h_b_pos_last = None
    for t in range(T - 1, -1, -1):
        h, c = cell(emb[:, t], h, c, params["w_ih_b"], params["w_hh_b"], b_b)
        if t == T - 1:
            h_b_pos_last = h
    h_b_final, c_b_final = h, c

    last = jnp.concatenate([h_f_last, h_b_pos_last], axis=-1)
    logits = last @ params["w_fc"].T + params["b_fc"]
    logp = jax.nn.log_softmax(logits, axis=1)
    h_n = jnp.stack([h_f_last, h_b_final])
    c_n = jnp.stack([c_f_last, c_b_final])
    return logp, (h_n, c_n)


if __name__ == "__main__":
    VOCAB = 50
    EMB = 32
    HIDDEN = 32
    CLASSES = 4
    LAYERS = 1
    BIDIR = True
    B, T = 8, 10

    key = jax.random.PRNGKey(0)
    k_param, k_tok = jax.random.split(key)
    params = init_params(k_param, VOCAB, EMB, HIDDEN, CLASSES)
    tokens = jax.random.randint(k_tok, (B, T), 0, VOCAB, dtype=jnp.int32)
    hidden = init_hidden(LAYERS, 2 if BIDIR else 1, B, HIDDEN)

    log_probs, (h_n, c_n) = bilstm_forward(params, tokens, hidden)
    jax.block_until_ready((log_probs, h_n, c_n))

    assert log_probs.shape == (B, CLASSES)
    assert h_n.shape == (2, B, HIDDEN) and c_n.shape == (2, B, HIDDEN)
    # log-softmax rows must sum (in prob space) to ~1
    assert bool(jnp.allclose(jnp.sum(jnp.exp(log_probs), axis=1), 1.0, atol=1e-4))

    # numerical check against a pure-JAX reference of the same module
    ref_logp, (ref_h, ref_c) = _reference_forward(params, tokens, hidden)
    assert bool(jnp.allclose(log_probs, ref_logp, atol=1e-4, rtol=1e-4))
    assert bool(jnp.allclose(h_n, ref_h, atol=1e-4, rtol=1e-4))
    assert bool(jnp.allclose(c_n, ref_c, atol=1e-4, rtol=1e-4))

    print("KERNEL_OK")
</pallas_src>

<mosaic_0001>
module attributes {stable_mosaic.version = 11 : i64} {
  func.func @_bilstm_fused_kernel(%arg0: i32, %arg1: memref<80x32xf32, #tpu.memory_space<vmem>>, %arg2: memref<32x256xf32, #tpu.memory_space<vmem>>, %arg3: memref<64x256xf32, #tpu.memory_space<vmem>>, %arg4: memref<1x256xf32, #tpu.memory_space<vmem>>, %arg5: memref<2x8x32xf32, #tpu.memory_space<vmem>>, %arg6: memref<2x8x32xf32, #tpu.memory_space<vmem>>, %arg7: memref<64x4xf32, #tpu.memory_space<vmem>>, %arg8: memref<1x4xf32, #tpu.memory_space<vmem>>, %arg9: memref<8x4xf32, #tpu.memory_space<vmem>>, %arg10: memref<2x8x32xf32, #tpu.memory_space<vmem>>, %arg11: memref<2x8x32xf32, #tpu.memory_space<vmem>>, %arg12: memref<80x256xf32, #tpu.memory_space<vmem>>) attributes {dimension_semantics = [#tpu.dimension_semantics<arbitrary>], iteration_bounds = array<i64: 1>, scalar_prefetch = 0 : i64, scratch_operands = 1 : i64, tpu.core_type = #tpu.core_type<tc>, window_params = [{pipeline_mode = #tpu.pipeline_mode<synchronous>, transform_indices = @transform_0, window_bounds = array<i64: 80, 32>}, {pipeline_mode = #tpu.pipeline_mode<synchronous>, transform_indices = @transform_1, window_bounds = array<i64: 32, 256>}, {pipeline_mode = #tpu.pipeline_mode<synchronous>, transform_indices = @transform_2, window_bounds = array<i64: 64, 256>}, {pipeline_mode = #tpu.pipeline_mode<synchronous>, transform_indices = @transform_3, window_bounds = array<i64: 1, 256>}, {pipeline_mode = #tpu.pipeline_mode<synchronous>, transform_indices = @transform_4, window_bounds = array<i64: 2, 8, 32>}, {pipeline_mode = #tpu.pipeline_mode<synchronous>, transform_indices = @transform_5, window_bounds = array<i64: 2, 8, 32>}, {pipeline_mode = #tpu.pipeline_mode<synchronous>, transform_indices = @transform_6, window_bounds = array<i64: 64, 4>}, {pipeline_mode = #tpu.pipeline_mode<synchronous>, transform_indices = @transform_7, window_bounds = array<i64: 1, 4>}, {pipeline_mode = #tpu.pipeline_mode<synchronous>, transform_indices = @transform_8, window_bounds = array<i64: 8, 4>}, {pipeline_mode = #tpu.pipeline_mode<synchronous>, transform_indices = @transform_9, window_bounds = array<i64: 2, 8, 32>}, {pipeline_mode = #tpu.pipeline_mode<synchronous>, transform_indices = @transform_10, window_bounds = array<i64: 2, 8, 32>}]} {
    %c0 = arith.constant 0 : index
    %c0_0 = arith.constant 0 : index
    %0 = vector.load %arg1[%c0, %c0_0] : memref<80x32xf32, #tpu.memory_space<vmem>>, vector<80x32xf32>
    %c0_1 = arith.constant 0 : index
    %c0_2 = arith.constant 0 : index
    %1 = vector.load %arg2[%c0_1, %c0_2] : memref<32x256xf32, #tpu.memory_space<vmem>>, vector<32x256xf32>
    %cst = arith.constant dense<0.000000e+00> : vector<80x256xf32>
    %2 = tpu.matmul %0, %1, %cst {dimension_numbers = #tpu.dot_dimension_numbers<[1], [0], [0], [1], [0, 0, 1, 1], [], []>} : vector<80x32xf32>, vector<32x256xf32>, vector<80x256xf32> -> vector<80x256xf32>
    %c0_3 = arith.constant 0 : index
    %c0_4 = arith.constant 0 : index
    %3 = vector.load %arg4[%c0_3, %c0_4] : memref<1x256xf32, #tpu.memory_space<vmem>>, vector<1x256xf32>
    %4 = vector.broadcast %3 : vector<1x256xf32> to vector<80x256xf32>
    %5 = arith.addf %2, %4 : vector<80x256xf32>
    %c0_5 = arith.constant 0 : index
    %c0_6 = arith.constant 0 : index
    %6 = vector.load %arg12[%c0_5, %c0_6] : memref<80x256xf32, #tpu.memory_space<vmem>>, vector<80x256xf32>
    tpu.vector_store %arg12[%c0_5, %c0_6], %5 {strides = array<i32>} : memref<80x256xf32, #tpu.memory_space<vmem>>, vector<80x256xf32>,
    %c0_7 = arith.constant 0 : index
    %c0_8 = arith.constant 0 : index
    %7 = vector.load %arg3[%c0_7, %c0_8] : memref<64x256xf32, #tpu.memory_space<vmem>>, vector<64x256xf32>
    %c0_9 = arith.constant 0 : index
    %c0_10 = arith.constant 0 : index
    %8 = vector.load %arg7[%c0_9, %c0_10] : memref<64x4xf32, #tpu.memory_space<vmem>>, vector<64x4xf32>
    %c0_11 = arith.constant 0 : index
    %c0_12 = arith.constant 0 : index
    %c0_13 = arith.constant 0 : index
    %9 = vector.load %arg5[%c0_11, %c0_12, %c0_13] : memref<2x8x32xf32, #tpu.memory_space<vmem>>, vector<1x8x32xf32>
    %10 = vector.shape_cast %9 : vector<1x8x32xf32> to vector<8x32xf32>
    %c1 = arith.constant 1 : index
    %c0_14 = arith.constant 0 : index
    %c0_15 = arith.constant 0 : index
    %11 = vector.load %arg5[%c1, %c0_14, %c0_15] : memref<2x8x32xf32, #tpu.memory_space<vmem>>, vector<1x8x32xf32>
    %12 = vector.shape_cast %11 : vector<1x8x32xf32> to vector<8x32xf32>
    %13 = tpu.concatenate %10, %12 in 1 : vector<8x32xf32>, vector<8x32xf32> -> vector<8x64xf32>
    %c0_16 = arith.constant 0 : index
    %c0_17 = arith.constant 0 : index
    %c0_18 = arith.constant 0 : index
    %14 = vector.load %arg6[%c0_16, %c0_17, %c0_18] : memref<2x8x32xf32, #tpu.memory_space<vmem>>, vector<1x8x32xf32>
    %15 = vector.shape_cast %14 : vector<1x8x32xf32> to vector<8x32xf32>
    %c1_19 = arith.constant 1 : index
    %c0_20 = arith.constant 0 : index
    %c0_21 = arith.constant 0 : index
    %16 = vector.load %arg6[%c1_19, %c0_20, %c0_21] : memref<2x8x32xf32, #tpu.memory_space<vmem>>, vector<1x8x32xf32>
    %17 = vector.shape_cast %16 : vector<1x8x32xf32> to vector<8x32xf32>
    %cst_22 = arith.constant dense<0.000000e+00> : vector<8x256xf32>
    %18 = tpu.matmul %13, %7, %cst_22 {dimension_numbers = #tpu.dot_dimension_numbers<[1], [0], [0], [1], [0, 0, 1, 1], [], []>} : vector<8x64xf32>, vector<64x256xf32>, vector<8x256xf32> -> vector<8x256xf32>
    %19 = vector.extract_strided_slice %18 {offsets = [0, 0], sizes = [8, 128], strides = [1, 1]} : vector<8x256xf32> to vector<8x128xf32>
    %c0_23 = arith.constant 0 : index
    %c0_24 = arith.constant 0 : index
    %20 = vector.load %arg12[%c0_23, %c0_24] : memref<80x256xf32, #tpu.memory_space<vmem>>, vector<8x128xf32>
    %21 = arith.addf %19, %20 : vector<8x128xf32>
    %22 = vector.extract_strided_slice %18 {offsets = [0, 128], sizes = [8, 128], strides = [1, 1]} : vector<8x256xf32> to vector<8x128xf32>
    %c72 = arith.constant 72 : index
    %c128 = arith.constant 128 : index
    %23 = vector.load %arg12[%c72, %c128] : memref<80x256xf32, #tpu.memory_space<vmem>>, vector<8x128xf32>
    %24 = arith.addf %22, %23 : vector<8x128xf32>
    %25 = arith.negf %21 : vector<8x128xf32>
    %26 = math.exp %25 : vector<8x128xf32>
    %cst_25 = arith.constant 1.000000e+00 : f32
    %27 = vector.broadcast %cst_25 : f32 to vector<8x128xf32>
    %28 = arith.addf %27, %26 : vector<8x128xf32>
    %29 = arith.divf %27, %28 : vector<8x128xf32>
    %30 = arith.negf %24 : vector<8x128xf32>
    %31 = math.exp %30 : vector<8x128xf32>
    %cst_26 = arith.constant 1.000000e+00 : f32
    %32 = vector.broadcast %cst_26 : f32 to vector<8x128xf32>
    %33 = arith.addf %32, %31 : vector<8x128xf32>
    %34 = arith.divf %32, %33 : vector<8x128xf32>
    %35 = vector.extract_strided_slice %21 {offsets = [0, 64], sizes = [8, 32], strides = [1, 1]} : vector<8x128xf32> to vector<8x32xf32>
    %36 = math.tanh %35 : vector<8x32xf32>
    %37 = vector.extract_strided_slice %24 {offsets = [0, 64], sizes = [8, 32], strides = [1, 1]} : vector<8x128xf32> to vector<8x32xf32>
    %38 = math.tanh %37 : vector<8x32xf32>
    %39 = vector.extract_strided_slice %29 {offsets = [0, 32], sizes = [8, 32], strides = [1, 1]} : vector<8x128xf32> to vector<8x32xf32>
    %40 = arith.mulf %39, %15 : vector<8x32xf32>
    %41 = vector.extract_strided_slice %29 {offsets = [0, 0], sizes = [8, 32], strides = [1, 1]} : vector<8x128xf32> to vector<8x32xf32>
    %42 = arith.mulf %41, %36 : vector<8x32xf32>
    %43 = arith.addf %40, %42 : vector<8x32xf32>
    %44 = vector.extract_strided_slice %34 {offsets = [0, 32], sizes = [8, 32], strides = [1, 1]} : vector<8x128xf32> to vector<8x32xf32>
    %45 = arith.mulf %44, %17 : vector<8x32xf32>
    %46 = vector.extract_strided_slice %34 {offsets = [0, 0], sizes = [8, 32], strides = [1, 1]} : vector<8x128xf32> to vector<8x32xf32>
    %47 = arith.mulf %46, %38 : vector<8x32xf32>
    %48 = arith.addf %45, %47 : vector<8x32xf32>
    %49 = vector.extract_strided_slice %29 {offsets = [0, 96], sizes = [8, 32], strides = [1, 1]} : vector<8x128xf32> to vector<8x32xf32>
    %50 = math.tanh %43 : vector<8x32xf32>
    %51 = arith.mulf %49, %50 : vector<8x32xf32>
    %52 = vector.extract_strided_slice %34 {offsets = [0, 96], sizes = [8, 32], strides = [1, 1]} : vector<8x128xf32> to vector<8x32xf32>
    %53 = math.tanh %48 : vector<8x32xf32>
    %54 = arith.mulf %52, %53 : vector<8x32xf32>
    %55 = tpu.concatenate %51, %54 in 1 : vector<8x32xf32>, vector<8x32xf32> -> vector<8x64xf32>
    %56 = vector.extract_strided_slice %55 {offsets = [0, 32], sizes = [8, 32], strides = [1, 1]} : vector<8x64xf32> to vector<8x32xf32>
    %c1_i32 = arith.constant 1 : i32
    %c8_i32 = arith.constant 8 : i32
    %57 = arith.muli %c1_i32, %c8_i32 : i32
    %58 = tpu.assume_multiple %57, 8 : i32
    %c9_i32 = arith.constant 9 : i32
    %59 = arith.subi %c9_i32, %c1_i32 : i32
    %c8_i32_27 = arith.constant 8 : i32
    %60 = arith.muli %59, %c8_i32_27 : i32
    %61 = tpu.assume_multiple %60, 8 : i32
    %cst_28 = arith.constant dense<0.000000e+00> : vector<8x256xf32>
    %62 = tpu.matmul %55, %7, %cst_28 {dimension_numbers = #tpu.dot_dimension_numbers<[1], [0], [0], [1], [0, 0, 1, 1], [], []>} : vector<8x64xf32>, vector<64x256xf32>, vector<8x256xf32> -> vector<8x256xf32>
    %63 = vector.extract_strided_slice %62 {offsets = [0, 0], sizes = [8, 128], strides = [1, 1]} : vector<8x256xf32> to vector<8x128xf32>
    %64 = arith.index_cast %58 : i32 to index
    %c0_29 = arith.constant 0 : index
    %65 = vector.load %arg12[%64, %c0_29] : memref<80x256xf32, #tpu.memory_space<vmem>>, vector<8x128xf32>
    %66 = arith.addf %63, %65 : vector<8x128xf32>
    %67 = vector.extract_strided_slice %62 {offsets = [0, 128], sizes = [8, 128], strides = [1, 1]} : vector<8x256xf32> to vector<8x128xf32>
    %68 = arith.index_cast %61 : i32 to index
    %c128_30 = arith.constant 128 : index
    %69 = vector.load %arg12[%68, %c128_30] : memref<80x256xf32, #tpu.memory_space<vmem>>, vector<8x128xf32>
    %70 = arith.addf %67, %69 : vector<8x128xf32>
    %71 = arith.negf %66 : vector<8x128xf32>
    %72 = math.exp %71 : vector<8x128xf32>
    %cst_31 = arith.constant 1.000000e+00 : f32
    %73 = vector.broadcast %cst_31 : f32 to vector<8x128xf32>
    %74 = arith.addf %73, %72 : vector<8x128xf32>
    %75 = arith.divf %73, %74 : vector<8x128xf32>
    %76 = arith.negf %70 : vector<8x128xf32>
    %77 = math.exp %76 : vector<8x128xf32>
    %cst_32 = arith.constant 1.000000e+00 : f32
    %78 = vector.broadcast %cst_32 : f32 to vector<8x128xf32>
    %79 = arith.addf %78, %77 : vector<8x128xf32>
    %80 = arith.divf %78, %79 : vector<8x128xf32>
    %81 = vector.extract_strided_slice %66 {offsets = [0, 64], sizes = [8, 32], strides = [1, 1]} : vector<8x128xf32> to vector<8x32xf32>
    %82 = math.tanh %81 : vector<8x32xf32>
    %83 = vector.extract_strided_slice %70 {offsets = [0, 64], sizes = [8, 32], strides = [1, 1]} : vector<8x128xf32> to vector<8x32xf32>
    %84 = math.tanh %83 : vector<8x32xf32>
    %85 = vector.extract_strided_slice %75 {offsets = [0, 32], sizes = [8, 32], strides = [1, 1]} : vector<8x128xf32> to vector<8x32xf32>
    %86 = arith.mulf %85, %43 : vector<8x32xf32>
    %87 = vector.extract_strided_slice %75 {offsets = [0, 0], sizes = [8, 32], strides = [1, 1]} : vector<8x128xf32> to vector<8x32xf32>
    %88 = arith.mulf %87, %82 : vector<8x32xf32>
    %89 = arith.addf %86, %88 : vector<8x32xf32>
    %90 = vector.extract_strided_slice %80 {offsets = [0, 32], sizes = [8, 32], strides = [1, 1]} : vector<8x128xf32> to vector<8x32xf32>
    %91 = arith.mulf %90, %48 : vector<8x32xf32>
    %92 = vector.extract_strided_slice %80 {offsets = [0, 0], sizes = [8, 32], strides = [1, 1]} : vector<8x128xf32> to vector<8x32xf32>
    %93 = arith.mulf %92, %84 : vector<8x32xf32>
    %94 = arith.addf %91, %93 : vector<8x32xf32>
    %95 = vector.extract_strided_slice %75 {offsets = [0, 96], sizes = [8, 32], strides = [1, 1]} : vector<8x128xf32> to vector<8x32xf32>
    %96 = math.tanh %89 : vector<8x32xf32>
    %97 = arith.mulf %95, %96 : vector<8x32xf32>
    %98 = vector.extract_strided_slice %80 {offsets = [0, 96], sizes = [8, 32], strides = [1, 1]} : vector<8x128xf32> to vector<8x32xf32>
    %99 = math.tanh %94 : vector<8x32xf32>
    %100 = arith.mulf %98, %99 : vector<8x32xf32>
    %101 = tpu.concatenate %97, %100 in 1 : vector<8x32xf32>, vector<8x32xf32> -> vector<8x64xf32>
    %c2_i32 = arith.constant 2 : i32
    %c8_i32_33 = arith.constant 8 : i32
    %102 = arith.muli %c2_i32, %c8_i32_33 : i32
    %103 = tpu.assume_multiple %102, 8 : i32
    %c9_i32_34 = arith.constant 9 : i32
    %104 = arith.subi %c9_i32_34, %c2_i32 : i32
    %c8_i32_35 = arith.constant 8 : i32
    %105 = arith.muli %104, %c8_i32_35 : i32
    %106 = tpu.assume_multiple %105, 8 : i32
    %cst_36 = arith.constant dense<0.000000e+00> : vector<8x256xf32>
    %107 = tpu.matmul %101, %7, %cst_36 {dimension_numbers = #tpu.dot_dimension_numbers<[1], [0], [0], [1], [0, 0, 1, 1], [], []>} : vector<8x64xf32>, vector<64x256xf32>, vector<8x256xf32> -> vector<8x256xf32>
    %108 = vector.extract_strided_slice %107 {offsets = [0, 0], sizes = [8, 128], strides = [1, 1]} : vector<8x256xf32> to vector<8x128xf32>
    %109 = arith.index_cast %103 : i32 to index
    %c0_37 = arith.constant 0 : index
    %110 = vector.load %arg12[%109, %c0_37] : memref<80x256xf32, #tpu.memory_space<vmem>>, vector<8x128xf32>
    %111 = arith.addf %108, %110 : vector<8x128xf32>
    %112 = vector.extract_strided_slice %107 {offsets = [0, 128], sizes = [8, 128], strides = [1, 1]} : vector<8x256xf32> to vector<8x128xf32>
    %113 = arith.index_cast %106 : i32 to index
    %c128_38 = arith.constant 128 : index
    %114 = vector.load %arg12[%113, %c128_38] : memref<80x256xf32, #tpu.memory_space<vmem>>, vector<8x128xf32>
    %115 = arith.addf %112, %114 : vector<8x128xf32>
    %116 = arith.negf %111 : vector<8x128xf32>
    %117 = math.exp %116 : vector<8x128xf32>
    %cst_39 = arith.constant 1.000000e+00 : f32
    %118 = vector.broadcast %cst_39 : f32 to vector<8x128xf32>
    %119 = arith.addf %118, %117 : vector<8x128xf32>
    %120 = arith.divf %118, %119 : vector<8x128xf32>
    %121 = arith.negf %115 : vector<8x128xf32>
    %122 = math.exp %121 : vector<8x128xf32>
    %cst_40 = arith.constant 1.000000e+00 : f32
    %123 = vector.broadcast %cst_40 : f32 to vector<8x128xf32>
    %124 = arith.addf %123, %122 : vector<8x128xf32>
    %125 = arith.divf %123, %124 : vector<8x128xf32>
    %126 = vector.extract_strided_slice %111 {offsets = [0, 64], sizes = [8, 32], strides = [1, 1]} : vector<8x128xf32> to vector<8x32xf32>
    %127 = math.tanh %126 : vector<8x32xf32>
    %128 = vector.extract_strided_slice %115 {offsets = [0, 64], sizes = [8, 32], strides = [1, 1]} : vector<8x128xf32> to vector<8x32xf32>
    %129 = math.tanh %128 : vector<8x32xf32>
    %130 = vector.extract_strided_slice %120 {offsets = [0, 32], sizes = [8, 32], strides = [1, 1]} : vector<8x128xf32> to vector<8x32xf32>
    %131 = arith.mulf %130, %89 : vector<8x32xf32>
    %132 = vector.extract_strided_slice %120 {offsets = [0, 0], sizes = [8, 32], strides = [1, 1]} : vector<8x128xf32> to vector<8x32xf32>
    %133 = arith.mulf %132, %127 : vector<8x32xf32>
    %134 = arith.addf %131, %133 : vector<8x32xf32>
    %135 = vector.extract_strided_slice %125 {offsets = [0, 32], sizes = [8, 32], strides = [1, 1]} : vector<8x128xf32> to vector<8x32xf32>
    %136 = arith.mulf %135, %94 : vector<8x32xf32>
    %137 = vector.extract_strided_slice %125 {offsets = [0, 0], sizes = [8, 32], strides = [1, 1]} : vector<8x128xf32> to vector<8x32xf32>
    %138 = arith.mulf %137, %129 : vector<8x32xf32>
    %139 = arith.addf %136, %138 : vector<8x32xf32>
    %140 = vector.extract_strided_slice %120 {offsets = [0, 96], sizes = [8, 32], strides = [1, 1]} : vector<8x128xf32> to vector<8x32xf32>
    %141 = math.tanh %134 : vector<8x32xf32>
    %142 = arith.mulf %140, %141 : vector<8x32xf32>
    %143 = vector.extract_strided_slice %125 {offsets = [0, 96], sizes = [8, 32], strides = [1, 1]} : vector<8x128xf32> to vector<8x32xf32>
    %144 = math.tanh %139 : vector<8x32xf32>
    %145 = arith.mulf %143, %144 : vector<8x32xf32>
    %146 = tpu.concatenate %142, %145 in 1 : vector<8x32xf32>, vector<8x32xf32> -> vector<8x64xf32>
    %c3_i32 = arith.constant 3 : i32
    %c8_i32_41 = arith.constant 8 : i32
    %147 = arith.muli %c3_i32, %c8_i32_41 : i32
    %148 = tpu.assume_multiple %147, 8 : i32
    %c9_i32_42 = arith.constant 9 : i32
    %149 = arith.subi %c9_i32_42, %c3_i32 : i32
    %c8_i32_43 = arith.constant 8 : i32
    %150 = arith.muli %149, %c8_i32_43 : i32
    %151 = tpu.assume_multiple %150, 8 : i32
    %cst_44 = arith.constant dense<0.000000e+00> : vector<8x256xf32>
    %152 = tpu.matmul %146, %7, %cst_44 {dimension_numbers = #tpu.dot_dimension_numbers<[1], [0], [0], [1], [0, 0, 1, 1], [], []>} : vector<8x64xf32>, vector<64x256xf32>, vector<8x256xf32> -> vector<8x256xf32>
    %153 = vector.extract_strided_slice %152 {offsets = [0, 0], sizes = [8, 128], strides = [1, 1]} : vector<8x256xf32> to vector<8x128xf32>
    %154 = arith.index_cast %148 : i32 to index
    %c0_45 = arith.constant 0 : index
    %155 = vector.load %arg12[%154, %c0_45] : memref<80x256xf32, #tpu.memory_space<vmem>>, vector<8x128xf32>
    %156 = arith.addf %153, %155 : vector<8x128xf32>
    %157 = vector.extract_strided_slice %152 {offsets = [0, 128], sizes = [8, 128], strides = [1, 1]} : vector<8x256xf32> to vector<8x128xf32>
    %158 = arith.index_cast %151 : i32 to index
    %c128_46 = arith.constant 128 : index
    %159 = vector.load %arg12[%158, %c128_46] : memref<80x256xf32, #tpu.memory_space<vmem>>, vector<8x128xf32>
    %160 = arith.addf %157, %159 : vector<8x128xf32>
    %161 = arith.negf %156 : vector<8x128xf32>
    %162 = math.exp %161 : vector<8x128xf32>
    %cst_47 = arith.constant 1.000000e+00 : f32
    %163 = vector.broadcast %cst_47 : f32 to vector<8x128xf32>
    %164 = arith.addf %163, %162 : vector<8x128xf32>
    %165 = arith.divf %163, %164 : vector<8x128xf32>
    %166 = arith.negf %160 : vector<8x128xf32>
    %167 = math.exp %166 : vector<8x128xf32>
    %cst_48 = arith.constant 1.000000e+00 : f32
    %168 = vector.broadcast %cst_48 : f32 to vector<8x128xf32>
    %169 = arith.addf %168, %167 : vector<8x128xf32>
    %170 = arith.divf %168, %169 : vector<8x128xf32>
    %171 = vector.extract_strided_slice %156 {offsets = [0, 64], sizes = [8, 32], strides = [1, 1]} : vector<8x128xf32> to vector<8x32xf32>
    %172 = math.tanh %171 : vector<8x32xf32>
    %173 = vector.extract_strided_slice %160 {offsets = [0, 64], sizes = [8, 32], strides = [1, 1]} : vector<8x128xf32> to vector<8x32xf32>
    %174 = math.tanh %173 : vector<8x32xf32>
    %175 = vector.extract_strided_slice %165 {offsets = [0, 32], sizes = [8, 32], strides = [1, 1]} : vector<8x128xf32> to vector<8x32xf32>
    %176 = arith.mulf %175, %134 : vector<8x32xf32>
    %177 = vector.extract_strided_slice %165 {offsets = [0, 0], sizes = [8, 32], strides = [1, 1]} : vector<8x128xf32> to vector<8x32xf32>
    %178 = arith.mulf %177, %172 : vector<8x32xf32>
    %179 = arith.addf %176, %178 : vector<8x32xf32>
    %180 = vector.extract_strided_slice %170 {offsets = [0, 32], sizes = [8, 32], strides = [1, 1]} : vector<8x128xf32> to vector<8x32xf32>
    %181 = arith.mulf %180, %139 : vector<8x32xf32>
    %182 = vector.extract_strided_slice %170 {offsets = [0, 0], sizes = [8, 32], strides = [1, 1]} : vector<8x128xf32> to vector<8x32xf32>
    %183 = arith.mulf %182, %174 : vector<8x32xf32>
    %184 = arith.addf %181, %183 : vector<8x32xf32>
    %185 = vector.extract_strided_slice %165 {offsets = [0, 96], sizes = [8, 32], strides = [1, 1]} : vector<8x128xf32> to vector<8x32xf32>
    %186 = math.tanh %179 : vector<8x32xf32>
    %187 = arith.mulf %185, %186 : vector<8x32xf32>
    %188 = vector.extract_strided_slice %170 {offsets = [0, 96], sizes = [8, 32], strides = [1, 1]} : vector<8x128xf32> to vector<8x32xf32>
    %189 = math.tanh %184 : vector<8x32xf32>
    %190 = arith.mulf %188, %189 : vector<8x32xf32>
    %191 = tpu.concatenate %187, %190 in 1 : vector<8x32xf32>, vector<8x32xf32> -> vector<8x64xf32>
    %c4_i32 = arith.constant 4 : i32
    %c8_i32_49 = arith.constant 8 : i32
    %192 = arith.muli %c4_i32, %c8_i32_49 : i32
    %193 = tpu.assume_multiple %192, 8 : i32
    %c9_i32_50 = arith.constant 9 : i32
    %194 = arith.subi %c9_i32_50, %c4_i32 : i32
    %c8_i32_51 = arith.constant 8 : i32
    %195 = arith.muli %194, %c8_i32_51 : i32
    %196 = tpu.assume_multiple %195, 8 : i32
    %cst_52 = arith.constant dense<0.000000e+00> : vector<8x256xf32>
    %197 = tpu.matmul %191, %7, %cst_52 {dimension_numbers = #tpu.dot_dimension_numbers<[1], [0], [0], [1], [0, 0, 1, 1], [], []>} : vector<8x64xf32>, vector<64x256xf32>, vector<8x256xf32> -> vector<8x256xf32>
    %198 = vector.extract_strided_slice %197 {offsets = [0, 0], sizes = [8, 128], strides = [1, 1]} : vector<8x256xf32> to vector<8x128xf32>
    %199 = arith.index_cast %193 : i32 to index
    %c0_53 = arith.constant 0 : index
    %200 = vector.load %arg12[%199, %c0_53] : memref<80x256xf32, #tpu.memory_space<vmem>>, vector<8x128xf32>
    %201 = arith.addf %198, %200 : vector<8x128xf32>
    %202 = vector.extract_strided_slice %197 {offsets = [0, 128], sizes = [8, 128], strides = [1, 1]} : vector<8x256xf32> to vector<8x128xf32>
    %203 = arith.index_cast %196 : i32 to index
    %c128_54 = arith.constant 128 : index
    %204 = vector.load %arg12[%203, %c128_54] : memref<80x256xf32, #tpu.memory_space<vmem>>, vector<8x128xf32>
    %205 = arith.addf %202, %204 : vector<8x128xf32>
    %206 = arith.negf %201 : vector<8x128xf32>
    %207 = math.exp %206 : vector<8x128xf32>
    %cst_55 = arith.constant 1.000000e+00 : f32
    %208 = vector.broadcast %cst_55 : f32 to vector<8x128xf32>
    %209 = arith.addf %208, %207 : vector<8x128xf32>
    %210 = arith.divf %208, %209 : vector<8x128xf32>
    %211 = arith.negf %205 : vector<8x128xf32>
    %212 = math.exp %211 : vector<8x128xf32>
    %cst_56 = arith.constant 1.000000e+00 : f32
    %213 = vector.broadcast %cst_56 : f32 to vector<8x128xf32>
    %214 = arith.addf %213, %212 : vector<8x128xf32>
    %215 = arith.divf %213, %214 : vector<8x128xf32>
    %216 = vector.extract_strided_slice %201 {offsets = [0, 64], sizes = [8, 32], strides = [1, 1]} : vector<8x128xf32> to vector<8x32xf32>
    %217 = math.tanh %216 : vector<8x32xf32>
    %218 = vector.extract_strided_slice %205 {offsets = [0, 64], sizes = [8, 32], strides = [1, 1]} : vector<8x128xf32> to vector<8x32xf32>
    %219 = math.tanh %218 : vector<8x32xf32>
    %220 = vector.extract_strided_slice %210 {offsets = [0, 32], sizes = [8, 32], strides = [1, 1]} : vector<8x128xf32> to vector<8x32xf32>
    %221 = arith.mulf %220, %179 : vector<8x32xf32>
    %222 = vector.extract_strided_slice %210 {offsets = [0, 0], sizes = [8, 32], strides = [1, 1]} : vector<8x128xf32> to vector<8x32xf32>
    %223 = arith.mulf %222, %217 : vector<8x32xf32>
    %224 = arith.addf %221, %223 : vector<8x32xf32>
    %225 = vector.extract_strided_slice %215 {offsets = [0, 32], sizes = [8, 32], strides = [1, 1]} : vector<8x128xf32> to vector<8x32xf32>
    %226 = arith.mulf %225, %184 : vector<8x32xf32>
    %227 = vector.extract_strided_slice %215 {offsets = [0, 0], sizes = [8, 32], strides = [1, 1]} : vector<8x128xf32> to vector<8x32xf32>
    %228 = arith.mulf %227, %219 : vector<8x32xf32>
    %229 = arith.addf %226, %228 : vector<8x32xf32>
    %230 = vector.extract_strided_slice %210 {offsets = [0, 96], sizes = [8, 32], strides = [1, 1]} : vector<8x128xf32> to vector<8x32xf32>
    %231 = math.tanh %224 : vector<8x32xf32>
    %232 = arith.mulf %230, %231 : vector<8x32xf32>
    %233 = vector.extract_strided_slice %215 {offsets = [0, 96], sizes = [8, 32], strides = [1, 1]} : vector<8x128xf32> to vector<8x32xf32>
    %234 = math.tanh %229 : vector<8x32xf32>
    %235 = arith.mulf %233, %234 : vector<8x32xf32>
    %236 = tpu.concatenate %232, %235 in 1 : vector<8x32xf32>, vector<8x32xf32> -> vector<8x64xf32>
    %c5_i32 = arith.constant 5 : i32
    %c8_i32_57 = arith.constant 8 : i32
    %237 = arith.muli %c5_i32, %c8_i32_57 : i32
    %238 = tpu.assume_multiple %237, 8 : i32
    %c9_i32_58 = arith.constant 9 : i32
    %239 = arith.subi %c9_i32_58, %c5_i32 : i32
    %c8_i32_59 = arith.constant 8 : i32
    %240 = arith.muli %239, %c8_i32_59 : i32
    %241 = tpu.assume_multiple %240, 8 : i32
    %cst_60 = arith.constant dense<0.000000e+00> : vector<8x256xf32>
    %242 = tpu.matmul %236, %7, %cst_60 {dimension_numbers = #tpu.dot_dimension_numbers<[1], [0], [0], [1], [0, 0, 1, 1], [], []>} : vector<8x64xf32>, vector<64x256xf32>, vector<8x256xf32> -> vector<8x256xf32>
    %243 = vector.extract_strided_slice %242 {offsets = [0, 0], sizes = [8, 128], strides = [1, 1]} : vector<8x256xf32> to vector<8x128xf32>
    %244 = arith.index_cast %238 : i32 to index
    %c0_61 = arith.constant 0 : index
    %245 = vector.load %arg12[%244, %c0_61] : memref<80x256xf32, #tpu.memory_space<vmem>>, vector<8x128xf32>
    %246 = arith.addf %243, %245 : vector<8x128xf32>
    %247 = vector.extract_strided_slice %242 {offsets = [0, 128], sizes = [8, 128], strides = [1, 1]} : vector<8x256xf32> to vector<8x128xf32>
    %248 = arith.index_cast %241 : i32 to index
    %c128_62 = arith.constant 128 : index
    %249 = vector.load %arg12[%248, %c128_62] : memref<80x256xf32, #tpu.memory_space<vmem>>, vector<8x128xf32>
    %250 = arith.addf %247, %249 : vector<8x128xf32>
    %251 = arith.negf %246 : vector<8x128xf32>
    %252 = math.exp %251 : vector<8x128xf32>
    %cst_63 = arith.constant 1.000000e+00 : f32
    %253 = vector.broadcast %cst_63 : f32 to vector<8x128xf32>
    %254 = arith.addf %253, %252 : vector<8x128xf32>
    %255 = arith.divf %253, %254 : vector<8x128xf32>
    %256 = arith.negf %250 : vector<8x128xf32>
    %257 = math.exp %256 : vector<8x128xf32>
    %cst_64 = arith.constant 1.000000e+00 : f32
    %258 = vector.broadcast %cst_64 : f32 to vector<8x128xf32>
    %259 = arith.addf %258, %257 : vector<8x128xf32>
    %260 = arith.divf %258, %259 : vector<8x128xf32>
    %261 = vector.extract_strided_slice %246 {offsets = [0, 64], sizes = [8, 32], strides = [1, 1]} : vector<8x128xf32> to vector<8x32xf32>
    %262 = math.tanh %261 : vector<8x32xf32>
    %263 = vector.extract_strided_slice %250 {offsets = [0, 64], sizes = [8, 32], strides = [1, 1]} : vector<8x128xf32> to vector<8x32xf32>
    %264 = math.tanh %263 : vector<8x32xf32>
    %265 = vector.extract_strided_slice %255 {offsets = [0, 32], sizes = [8, 32], strides = [1, 1]} : vector<8x128xf32> to vector<8x32xf32>
    %266 = arith.mulf %265, %224 : vector<8x32xf32>
    %267 = vector.extract_strided_slice %255 {offsets = [0, 0], sizes = [8, 32], strides = [1, 1]} : vector<8x128xf32> to vector<8x32xf32>
    %268 = arith.mulf %267, %262 : vector<8x32xf32>
    %269 = arith.addf %266, %268 : vector<8x32xf32>
    %270 = vector.extract_strided_slice %260 {offsets = [0, 32], sizes = [8, 32], strides = [1, 1]} : vector<8x128xf32> to vector<8x32xf32>
    %271 = arith.mulf %270, %229 : vector<8x32xf32>
    %272 = vector.extract_strided_slice %260 {offsets = [0, 0], sizes = [8, 32], strides = [1, 1]} : vector<8x128xf32> to vector<8x32xf32>
    %273 = arith.mulf %272, %264 : vector<8x32xf32>
    %274 = arith.addf %271, %273 : vector<8x32xf32>
    %275 = vector.extract_strided_slice %255 {offsets = [0, 96], sizes = [8, 32], strides = [1, 1]} : vector<8x128xf32> to vector<8x32xf32>
    %276 = math.tanh %269 : vector<8x32xf32>
    %277 = arith.mulf %275, %276 : vector<8x32xf32>
    %278 = vector.extract_strided_slice %260 {offsets = [0, 96], sizes = [8, 32], strides = [1, 1]} : vector<8x128xf32> to vector<8x32xf32>
    %279 = math.tanh %274 : vector<8x32xf32>
    %280 = arith.mulf %278, %279 : vector<8x32xf32>
    %281 = tpu.concatenate %277, %280 in 1 : vector<8x32xf32>, vector<8x32xf32> -> vector<8x64xf32>
    %c6_i32 = arith.constant 6 : i32
    %c8_i32_65 = arith.constant 8 : i32
    %282 = arith.muli %c6_i32, %c8_i32_65 : i32
    %283 = tpu.assume_multiple %282, 8 : i32
    %c9_i32_66 = arith.constant 9 : i32
    %284 = arith.subi %c9_i32_66, %c6_i32 : i32
    %c8_i32_67 = arith.constant 8 : i32
    %285 = arith.muli %284, %c8_i32_67 : i32
    %286 = tpu.assume_multiple %285, 8 : i32
    %cst_68 = arith.constant dense<0.000000e+00> : vector<8x256xf32>
    %287 = tpu.matmul %281, %7, %cst_68 {dimension_numbers = #tpu.dot_dimension_numbers<[1], [0], [0], [1], [0, 0, 1, 1], [], []>} : vector<8x64xf32>, vector<64x256xf32>, vector<8x256xf32> -> vector<8x256xf32>
    %288 = vector.extract_strided_slice %287 {offsets = [0, 0], sizes = [8, 128], strides = [1, 1]} : vector<8x256xf32> to vector<8x128xf32>
    %289 = arith.index_cast %283 : i32 to index
    %c0_69 = arith.constant 0 : index
    %290 = vector.load %arg12[%289, %c0_69] : memref<80x256xf32, #tpu.memory_space<vmem>>, vector<8x128xf32>
    %291 = arith.addf %288, %290 : vector<8x128xf32>
    %292 = vector.extract_strided_slice %287 {offsets = [0, 128], sizes = [8, 128], strides = [1, 1]} : vector<8x256xf32> to vector<8x128xf32>
    %293 = arith.index_cast %286 : i32 to index
    %c128_70 = arith.constant 128 : index
    %294 = vector.load %arg12[%293, %c128_70] : memref<80x256xf32, #tpu.memory_space<vmem>>, vector<8x128xf32>
    %295 = arith.addf %292, %294 : vector<8x128xf32>
    %296 = arith.negf %291 : vector<8x128xf32>
    %297 = math.exp %296 : vector<8x128xf32>
    %cst_71 = arith.constant 1.000000e+00 : f32
    %298 = vector.broadcast %cst_71 : f32 to vector<8x128xf32>
    %299 = arith.addf %298, %297 : vector<8x128xf32>
    %300 = arith.divf %298, %299 : vector<8x128xf32>
    %301 = arith.negf %295 : vector<8x128xf32>
    %302 = math.exp %301 : vector<8x128xf32>
    %cst_72 = arith.constant 1.000000e+00 : f32
    %303 = vector.broadcast %cst_72 : f32 to vector<8x128xf32>
    %304 = arith.addf %303, %302 : vector<8x128xf32>
    %305 = arith.divf %303, %304 : vector<8x128xf32>
    %306 = vector.extract_strided_slice %291 {offsets = [0, 64], sizes = [8, 32], strides = [1, 1]} : vector<8x128xf32> to vector<8x32xf32>
    %307 = math.tanh %306 : vector<8x32xf32>
    %308 = vector.extract_strided_slice %295 {offsets = [0, 64], sizes = [8, 32], strides = [1, 1]} : vector<8x128xf32> to vector<8x32xf32>
    %309 = math.tanh %308 : vector<8x32xf32>
    %310 = vector.extract_strided_slice %300 {offsets = [0, 32], sizes = [8, 32], strides = [1, 1]} : vector<8x128xf32> to vector<8x32xf32>
    %311 = arith.mulf %310, %269 : vector<8x32xf32>
    %312 = vector.extract_strided_slice %300 {offsets = [0, 0], sizes = [8, 32], strides = [1, 1]} : vector<8x128xf32> to vector<8x32xf32>
    %313 = arith.mulf %312, %307 : vector<8x32xf32>
    %314 = arith.addf %311, %313 : vector<8x32xf32>
    %315 = vector.extract_strided_slice %305 {offsets = [0, 32], sizes = [8, 32], strides = [1, 1]} : vector<8x128xf32> to vector<8x32xf32>
    %316 = arith.mulf %315, %274 : vector<8x32xf32>
    %317 = vector.extract_strided_slice %305 {offsets = [0, 0], sizes = [8, 32], strides = [1, 1]} : vector<8x128xf32> to vector<8x32xf32>
    %318 = arith.mulf %317, %309 : vector<8x32xf32>
    %319 = arith.addf %316, %318 : vector<8x32xf32>
    %320 = vector.extract_strided_slice %300 {offsets = [0, 96], sizes = [8, 32], strides = [1, 1]} : vector<8x128xf32> to vector<8x32xf32>
    %321 = math.tanh %314 : vector<8x32xf32>
    %322 = arith.mulf %320, %321 : vector<8x32xf32>
    %323 = vector.extract_strided_slice %305 {offsets = [0, 96], sizes = [8, 32], strides = [1, 1]} : vector<8x128xf32> to vector<8x32xf32>
    %324 = math.tanh %319 : vector<8x32xf32>
    %325 = arith.mulf %323, %324 : vector<8x32xf32>
    %326 = tpu.concatenate %322, %325 in 1 : vector<8x32xf32>, vector<8x32xf32> -> vector<8x64xf32>
    %c7_i32 = arith.constant 7 : i32
    %c8_i32_73 = arith.constant 8 : i32
    %327 = arith.muli %c7_i32, %c8_i32_73 : i32
    %328 = tpu.assume_multiple %327, 8 : i32
    %c9_i32_74 = arith.constant 9 : i32
    %329 = arith.subi %c9_i32_74, %c7_i32 : i32
    %c8_i32_75 = arith.constant 8 : i32
    %330 = arith.muli %329, %c8_i32_75 : i32
    %331 = tpu.assume_multiple %330, 8 : i32
    %cst_76 = arith.constant dense<0.000000e+00> : vector<8x256xf32>
    %332 = tpu.matmul %326, %7, %cst_76 {dimension_numbers = #tpu.dot_dimension_numbers<[1], [0], [0], [1], [0, 0, 1, 1], [], []>} : vector<8x64xf32>, vector<64x256xf32>, vector<8x256xf32> -> vector<8x256xf32>
    %333 = vector.extract_strided_slice %332 {offsets = [0, 0], sizes = [8, 128], strides = [1, 1]} : vector<8x256xf32> to vector<8x128xf32>
    %334 = arith.index_cast %328 : i32 to index
    %c0_77 = arith.constant 0 : index
    %335 = vector.load %arg12[%334, %c0_77] : memref<80x256xf32, #tpu.memory_space<vmem>>, vector<8x128xf32>
    %336 = arith.addf %333, %335 : vector<8x128xf32>
    %337 = vector.extract_strided_slice %332 {offsets = [0, 128], sizes = [8, 128], strides = [1, 1]} : vector<8x256xf32> to vector<8x128xf32>
    %338 = arith.index_cast %331 : i32 to index
    %c128_78 = arith.constant 128 : index
    %339 = vector.load %arg12[%338, %c128_78] : memref<80x256xf32, #tpu.memory_space<vmem>>, vector<8x128xf32>
    %340 = arith.addf %337, %339 : vector<8x128xf32>
    %341 = arith.negf %336 : vector<8x128xf32>
    %342 = math.exp %341 : vector<8x128xf32>
    %cst_79 = arith.constant 1.000000e+00 : f32
    %343 = vector.broadcast %cst_79 : f32 to vector<8x128xf32>
    %344 = arith.addf %343, %342 : vector<8x128xf32>
    %345 = arith.divf %343, %344 : vector<8x128xf32>
    %346 = arith.negf %340 : vector<8x128xf32>
    %347 = math.exp %346 : vector<8x128xf32>
    %cst_80 = arith.constant 1.000000e+00 : f32
    %348 = vector.broadcast %cst_80 : f32 to vector<8x128xf32>
    %349 = arith.addf %348, %347 : vector<8x128xf32>
    %350 = arith.divf %348, %349 : vector<8x128xf32>
    %351 = vector.extract_strided_slice %336 {offsets = [0, 64], sizes = [8, 32], strides = [1, 1]} : vector<8x128xf32> to vector<8x32xf32>
    %352 = math.tanh %351 : vector<8x32xf32>
    %353 = vector.extract_strided_slice %340 {offsets = [0, 64], sizes = [8, 32], strides = [1, 1]} : vector<8x128xf32> to vector<8x32xf32>
    %354 = math.tanh %353 : vector<8x32xf32>
    %355 = vector.extract_strided_slice %345 {offsets = [0, 32], sizes = [8, 32], strides = [1, 1]} : vector<8x128xf32> to vector<8x32xf32>
    %356 = arith.mulf %355, %314 : vector<8x32xf32>
    %357 = vector.extract_strided_slice %345 {offsets = [0, 0], sizes = [8, 32], strides = [1, 1]} : vector<8x128xf32> to vector<8x32xf32>
    %358 = arith.mulf %357, %352 : vector<8x32xf32>
    %359 = arith.addf %356, %358 : vector<8x32xf32>
    %360 = vector.extract_strided_slice %350 {offsets = [0, 32], sizes = [8, 32], strides = [1, 1]} : vector<8x128xf32> to vector<8x32xf32>
    %361 = arith.mulf %360, %319 : vector<8x32xf32>
    %362 = vector.extract_strided_slice %350 {offsets = [0, 0], sizes = [8, 32], strides = [1, 1]} : vector<8x128xf32> to vector<8x32xf32>
    %363 = arith.mulf %362, %354 : vector<8x32xf32>
    %364 = arith.addf %361, %363 : vector<8x32xf32>
    %365 = vector.extract_strided_slice %345 {offsets = [0, 96], sizes = [8, 32], strides = [1, 1]} : vector<8x128xf32> to vector<8x32xf32>
    %366 = math.tanh %359 : vector<8x32xf32>
    %367 = arith.mulf %365, %366 : vector<8x32xf32>
    %368 = vector.extract_strided_slice %350 {offsets = [0, 96], sizes = [8, 32], strides = [1, 1]} : vector<8x128xf32> to vector<8x32xf32>
    %369 = math.tanh %364 : vector<8x32xf32>
    %370 = arith.mulf %368, %369 : vector<8x32xf32>
    %371 = tpu.concatenate %367, %370 in 1 : vector<8x32xf32>, vector<8x32xf32> -> vector<8x64xf32>
    %c8_i32_81 = arith.constant 8 : i32
    %c8_i32_82 = arith.constant 8 : i32
    %372 = arith.muli %c8_i32_81, %c8_i32_82 : i32
    %373 = tpu.assume_multiple %372, 8 : i32
    %c9_i32_83 = arith.constant 9 : i32
    %374 = arith.subi %c9_i32_83, %c8_i32_81 : i32
    %c8_i32_84 = arith.constant 8 : i32
    %375 = arith.muli %374, %c8_i32_84 : i32
    %376 = tpu.assume_multiple %375, 8 : i32
    %cst_85 = arith.constant dense<0.000000e+00> : vector<8x256xf32>
    %377 = tpu.matmul %371, %7, %cst_85 {dimension_numbers = #tpu.dot_dimension_numbers<[1], [0], [0], [1], [0, 0, 1, 1], [], []>} : vector<8x64xf32>, vector<64x256xf32>, vector<8x256xf32> -> vector<8x256xf32>
    %378 = vector.extract_strided_slice %377 {offsets = [0, 0], sizes = [8, 128], strides = [1, 1]} : vector<8x256xf32> to vector<8x128xf32>
    %379 = arith.index_cast %373 : i32 to index
    %c0_86 = arith.constant 0 : index
    %380 = vector.load %arg12[%379, %c0_86] : memref<80x256xf32, #tpu.memory_space<vmem>>, vector<8x128xf32>
    %381 = arith.addf %378, %380 : vector<8x128xf32>
    %382 = vector.extract_strided_slice %377 {offsets = [0, 128], sizes = [8, 128], strides = [1, 1]} : vector<8x256xf32> to vector<8x128xf32>
    %383 = arith.index_cast %376 : i32 to index
    %c128_87 = arith.constant 128 : index
    %384 = vector.load %arg12[%383, %c128_87] : memref<80x256xf32, #tpu.memory_space<vmem>>, vector<8x128xf32>
    %385 = arith.addf %382, %384 : vector<8x128xf32>
    %386 = arith.negf %381 : vector<8x128xf32>
    %387 = math.exp %386 : vector<8x128xf32>
    %cst_88 = arith.constant 1.000000e+00 : f32
    %388 = vector.broadcast %cst_88 : f32 to vector<8x128xf32>
    %389 = arith.addf %388, %387 : vector<8x128xf32>
    %390 = arith.divf %388, %389 : vector<8x128xf32>
    %391 = arith.negf %385 : vector<8x128xf32>
    %392 = math.exp %391 : vector<8x128xf32>
    %cst_89 = arith.constant 1.000000e+00 : f32
    %393 = vector.broadcast %cst_89 : f32 to vector<8x128xf32>
    %394 = arith.addf %393, %392 : vector<8x128xf32>
    %395 = arith.divf %393, %394 : vector<8x128xf32>
    %396 = vector.extract_strided_slice %381 {offsets = [0, 64], sizes = [8, 32], strides = [1, 1]} : vector<8x128xf32> to vector<8x32xf32>
    %397 = math.tanh %396 : vector<8x32xf32>
    %398 = vector.extract_strided_slice %385 {offsets = [0, 64], sizes = [8, 32], strides = [1, 1]} : vector<8x128xf32> to vector<8x32xf32>
    %399 = math.tanh %398 : vector<8x32xf32>
    %400 = vector.extract_strided_slice %390 {offsets = [0, 32], sizes = [8, 32], strides = [1, 1]} : vector<8x128xf32> to vector<8x32xf32>
    %401 = arith.mulf %400, %359 : vector<8x32xf32>
    %402 = vector.extract_strided_slice %390 {offsets = [0, 0], sizes = [8, 32], strides = [1, 1]} : vector<8x128xf32> to vector<8x32xf32>
    %403 = arith.mulf %402, %397 : vector<8x32xf32>
    %404 = arith.addf %401, %403 : vector<8x32xf32>
    %405 = vector.extract_strided_slice %395 {offsets = [0, 32], sizes = [8, 32], strides = [1, 1]} : vector<8x128xf32> to vector<8x32xf32>
    %406 = arith.mulf %405, %364 : vector<8x32xf32>
    %407 = vector.extract_strided_slice %395 {offsets = [0, 0], sizes = [8, 32], strides = [1, 1]} : vector<8x128xf32> to vector<8x32xf32>
    %408 = arith.mulf %407, %399 : vector<8x32xf32>
    %409 = arith.addf %406, %408 : vector<8x32xf32>
    %410 = vector.extract_strided_slice %390 {offsets = [0, 96], sizes = [8, 32], strides = [1, 1]} : vector<8x128xf32> to vector<8x32xf32>
    %411 = math.tanh %404 : vector<8x32xf32>
    %412 = arith.mulf %410, %411 : vector<8x32xf32>
    %413 = vector.extract_strided_slice %395 {offsets = [0, 96], sizes = [8, 32], strides = [1, 1]} : vector<8x128xf32> to vector<8x32xf32>
    %414 = math.tanh %409 : vector<8x32xf32>
    %415 = arith.mulf %413, %414 : vector<8x32xf32>
    %416 = tpu.concatenate %412, %415 in 1 : vector<8x32xf32>, vector<8x32xf32> -> vector<8x64xf32>
    %c9_i32_90 = arith.constant 9 : i32
    %c8_i32_91 = arith.constant 8 : i32
    %417 = arith.muli %c9_i32_90, %c8_i32_91 : i32
    %418 = tpu.assume_multiple %417, 8 : i32
    %c9_i32_92 = arith.constant 9 : i32
    %419 = arith.subi %c9_i32_92, %c9_i32_90 : i32
    %c8_i32_93 = arith.constant 8 : i32
    %420 = arith.muli %419, %c8_i32_93 : i32
    %421 = tpu.assume_multiple %420, 8 : i32
    %cst_94 = arith.constant dense<0.000000e+00> : vector<8x256xf32>
    %422 = tpu.matmul %416, %7, %cst_94 {dimension_numbers = #tpu.dot_dimension_numbers<[1], [0], [0], [1], [0, 0, 1, 1], [], []>} : vector<8x64xf32>, vector<64x256xf32>, vector<8x256xf32> -> vector<8x256xf32>
    %423 = vector.extract_strided_slice %422 {offsets = [0, 0], sizes = [8, 128], strides = [1, 1]} : vector<8x256xf32> to vector<8x128xf32>
    %424 = arith.index_cast %418 : i32 to index
    %c0_95 = arith.constant 0 : index
    %425 = vector.load %arg12[%424, %c0_95] : memref<80x256xf32, #tpu.memory_space<vmem>>, vector<8x128xf32>
    %426 = arith.addf %423, %425 : vector<8x128xf32>
    %427 = vector.extract_strided_slice %422 {offsets = [0, 128], sizes = [8, 128], strides = [1, 1]} : vector<8x256xf32> to vector<8x128xf32>
    %428 = arith.index_cast %421 : i32 to index
    %c128_96 = arith.constant 128 : index
    %429 = vector.load %arg12[%428, %c128_96] : memref<80x256xf32, #tpu.memory_space<vmem>>, vector<8x128xf32>
    %430 = arith.addf %427, %429 : vector<8x128xf32>
    %431 = arith.negf %426 : vector<8x128xf32>
    %432 = math.exp %431 : vector<8x128xf32>
    %cst_97 = arith.constant 1.000000e+00 : f32
    %433 = vector.broadcast %cst_97 : f32 to vector<8x128xf32>
    %434 = arith.addf %433, %432 : vector<8x128xf32>
    %435 = arith.divf %433, %434 : vector<8x128xf32>
    %436 = arith.negf %430 : vector<8x128xf32>
    %437 = math.exp %436 : vector<8x128xf32>
    %cst_98 = arith.constant 1.000000e+00 : f32
    %438 = vector.broadcast %cst_98 : f32 to vector<8x128xf32>
    %439 = arith.addf %438, %437 : vector<8x128xf32>
    %440 = arith.divf %438, %439 : vector<8x128xf32>
    %441 = vector.extract_strided_slice %426 {offsets = [0, 64], sizes = [8, 32], strides = [1, 1]} : vector<8x128xf32> to vector<8x32xf32>
    %442 = math.tanh %441 : vector<8x32xf32>
    %443 = vector.extract_strided_slice %430 {offsets = [0, 64], sizes = [8, 32], strides = [1, 1]} : vector<8x128xf32> to vector<8x32xf32>
    %444 = math.tanh %443 : vector<8x32xf32>
    %445 = vector.extract_strided_slice %435 {offsets = [0, 32], sizes = [8, 32], strides = [1, 1]} : vector<8x128xf32> to vector<8x32xf32>
    %446 = arith.mulf %445, %404 : vector<8x32xf32>
    %447 = vector.extract_strided_slice %435 {offsets = [0, 0], sizes = [8, 32], strides = [1, 1]} : vector<8x128xf32> to vector<8x32xf32>
    %448 = arith.mulf %447, %442 : vector<8x32xf32>
    %449 = arith.addf %446, %448 : vector<8x32xf32>
    %450 = vector.extract_strided_slice %440 {offsets = [0, 32], sizes = [8, 32], strides = [1, 1]} : vector<8x128xf32> to vector<8x32xf32>
    %451 = arith.mulf %450, %409 : vector<8x32xf32>
    %452 = vector.extract_strided_slice %440 {offsets = [0, 0], sizes = [8, 32], strides = [1, 1]} : vector<8x128xf32> to vector<8x32xf32>
    %453 = arith.mulf %452, %444 : vector<8x32xf32>
    %454 = arith.addf %451, %453 : vector<8x32xf32>
    %455 = vector.extract_strided_slice %435 {offsets = [0, 96], sizes = [8, 32], strides = [1, 1]} : vector<8x128xf32> to vector<8x32xf32>
    %456 = math.tanh %449 : vector<8x32xf32>
    %457 = arith.mulf %455, %456 : vector<8x32xf32>
    %458 = vector.extract_strided_slice %440 {offsets = [0, 96], sizes = [8, 32], strides = [1, 1]} : vector<8x128xf32> to vector<8x32xf32>
    %459 = math.tanh %454 : vector<8x32xf32>
    %460 = arith.mulf %458, %459 : vector<8x32xf32>
    %461 = tpu.concatenate %457, %460 in 1 : vector<8x32xf32>, vector<8x32xf32> -> vector<8x64xf32>
    %c9_i32_99 = arith.constant 9 : i32
    %462 = vector.extract_strided_slice %461 {offsets = [0, 0], sizes = [8, 32], strides = [1, 1]} : vector<8x64xf32> to vector<8x32xf32>
    %463 = vector.extract_strided_slice %461 {offsets = [0, 32], sizes = [8, 32], strides = [1, 1]} : vector<8x64xf32> to vector<8x32xf32>
    %464 = vector.extract_strided_slice %8 {offsets = [0, 0], sizes = [32, 4], strides = [1, 1]} : vector<64x4xf32> to vector<32x4xf32>
    %cst_100 = arith.constant dense<0.000000e+00> : vector<8x4xf32>
    %465 = tpu.matmul %462, %464, %cst_100 {dimension_numbers = #tpu.dot_dimension_numbers<[1], [0], [0], [1], [0, 0, 1, 1], [], []>} : vector<8x32xf32>, vector<32x4xf32>, vector<8x4xf32> -> vector<8x4xf32>
    %466 = vector.extract_strided_slice %8 {offsets = [32, 0], sizes = [32, 4], strides = [1, 1]} : vector<64x4xf32> to vector<32x4xf32>
    %cst_101 = arith.constant dense<0.000000e+00> : vector<8x4xf32>
    %467 = tpu.matmul %56, %466, %cst_101 {dimension_numbers = #tpu.dot_dimension_numbers<[1], [0], [0], [1], [0, 0, 1, 1], [], []>} : vector<8x32xf32>, vector<32x4xf32>, vector<8x4xf32> -> vector<8x4xf32>
    %468 = arith.addf %465, %467 : vector<8x4xf32>
    %c0_102 = arith.constant 0 : index
    %c0_103 = arith.constant 0 : index
    %469 = vector.load %arg8[%c0_102, %c0_103] : memref<1x4xf32, #tpu.memory_space<vmem>>, vector<1x4xf32>
    %470 = vector.broadcast %469 : vector<1x4xf32> to vector<8x4xf32>
    %471 = arith.addf %468, %470 : vector<8x4xf32>
    %cst_104 = arith.constant dense<0xFF800000> : vector<8xf32>
    %472 = vector.multi_reduction <maximumf>, %471, %cst_104 [1] : vector<8x4xf32> to vector<8xf32>
    %473 = vector.shape_cast %472 : vector<8xf32> to vector<8x1xf32>
    %474 = vector.broadcast %473 : vector<8x1xf32> to vector<8x4xf32>
    %475 = arith.subf %471, %474 : vector<8x4xf32>
    %476 = math.exp %475 : vector<8x4xf32>
    %cst_105 = arith.constant dense<0.000000e+00> : vector<8xf32>
    %477 = vector.multi_reduction <add>, %476, %cst_105 [1] : vector<8x4xf32> to vector<8xf32>
    %478 = vector.shape_cast %477 : vector<8xf32> to vector<8x1xf32>
    %479 = math.log %478 : vector<8x1xf32>
    %480 = vector.broadcast %479 : vector<8x1xf32> to vector<8x4xf32>
    %481 = arith.subf %475, %480 : vector<8x4xf32>
    %c0_106 = arith.constant 0 : index
    %c0_107 = arith.constant 0 : index
    %482 = vector.load %arg9[%c0_106, %c0_107] : memref<8x4xf32, #tpu.memory_space<vmem>>, vector<8x4xf32>
    tpu.vector_store %arg9[%c0_106, %c0_107], %481 {strides = array<i32>} : memref<8x4xf32, #tpu.memory_space<vmem>>, vector<8x4xf32>,
    %c0_108 = arith.constant 0 : index
    %c0_109 = arith.constant 0 : index
    %c0_110 = arith.constant 0 : index
    %483 = vector.load %arg10[%c0_108, %c0_109, %c0_110] : memref<2x8x32xf32, #tpu.memory_space<vmem>>, vector<1x8x32xf32>
    %484 = vector.shape_cast %483 : vector<1x8x32xf32> to vector<8x32xf32>
    %485 = vector.shape_cast %462 : vector<8x32xf32> to vector<1x8x32xf32>
    tpu.vector_store %arg10[%c0_108, %c0_109, %c0_110], %485 {strides = array<i32>} : memref<2x8x32xf32, #tpu.memory_space<vmem>>, vector<1x8x32xf32>,
    %c1_111 = arith.constant 1 : index
    %c0_112 = arith.constant 0 : index
    %c0_113 = arith.constant 0 : index
    %486 = vector.load %arg10[%c1_111, %c0_112, %c0_113] : memref<2x8x32xf32, #tpu.memory_space<vmem>>, vector<1x8x32xf32>
    %487 = vector.shape_cast %486 : vector<1x8x32xf32> to vector<8x32xf32>
    %488 = vector.shape_cast %463 : vector<8x32xf32> to vector<1x8x32xf32>
    tpu.vector_store %arg10[%c1_111, %c0_112, %c0_113], %488 {strides = array<i32>} : memref<2x8x32xf32, #tpu.memory_space<vmem>>, vector<1x8x32xf32>,
    %c0_114 = arith.constant 0 : index
    %c0_115 = arith.constant 0 : index
    %c0_116 = arith.constant 0 : index
    %489 = vector.load %arg11[%c0_114, %c0_115, %c0_116] : memref<2x8x32xf32, #tpu.memory_space<vmem>>, vector<1x8x32xf32>
    %490 = vector.shape_cast %489 : vector<1x8x32xf32> to vector<8x32xf32>
    %491 = vector.shape_cast %449 : vector<8x32xf32> to vector<1x8x32xf32>
    tpu.vector_store %arg11[%c0_114, %c0_115, %c0_116], %491 {strides = array<i32>} : memref<2x8x32xf32, #tpu.memory_space<vmem>>, vector<1x8x32xf32>,
    %c1_117 = arith.constant 1 : index
    %c0_118 = arith.constant 0 : index
    %c0_119 = arith.constant 0 : index
    %492 = vector.load %arg11[%c1_117, %c0_118, %c0_119] : memref<2x8x32xf32, #tpu.memory_space<vmem>>, vector<1x8x32xf32>
    %493 = vector.shape_cast %492 : vector<1x8x32xf32> to vector<8x32xf32>
    %494 = vector.shape_cast %454 : vector<8x32xf32> to vector<1x8x32xf32>
    tpu.vector_store %arg11[%c1_117, %c0_118, %c0_119], %494 {strides = array<i32>} : memref<2x8x32xf32, #tpu.memory_space<vmem>>, vector<1x8x32xf32>,
    return
  }
  func.func @transform_0(%arg0: i32) -> (i32, i32) {
    %c0_i32 = arith.constant 0 : i32
    %c0_i32_0 = arith.constant 0 : i32
    %c0_i32_1 = arith.constant 0 : i32
    return %c0_i32, %c0_i32_0 : i32, i32
  }
  func.func @transform_1(%arg0: i32) -> (i32, i32) {
    %c0_i32 = arith.constant 0 : i32
    %c0_i32_0 = arith.constant 0 : i32
    %c0_i32_1 = arith.constant 0 : i32
    return %c0_i32, %c0_i32_0 : i32, i32
  }
  func.func @transform_2(%arg0: i32) -> (i32, i32) {
    %c0_i32 = arith.constant 0 : i32
    %c0_i32_0 = arith.constant 0 : i32
    %c0_i32_1 = arith.constant 0 : i32
    return %c0_i32, %c0_i32_0 : i32, i32
  }
  func.func @transform_3(%arg0: i32) -> (i32, i32) {
    %c0_i32 = arith.constant 0 : i32
    %c0_i32_0 = arith.constant 0 : i32
    %c0_i32_1 = arith.constant 0 : i32
    return %c0_i32, %c0_i32_0 : i32, i32
  }
  func.func @transform_4(%arg0: i32) -> (i32, i32, i32) {
    %c0_i32 = arith.constant 0 : i32
    %c0_i32_0 = arith.constant 0 : i32
    %c0_i32_1 = arith.constant 0 : i32
    %c0_i32_2 = arith.constant 0 : i32
    return %c0_i32, %c0_i32_0, %c0_i32_1 : i32, i32, i32
  }
  func.func @transform_5(%arg0: i32) -> (i32, i32, i32) {
    %c0_i32 = arith.constant 0 : i32
    %c0_i32_0 = arith.constant 0 : i32
    %c0_i32_1 = arith.constant 0 : i32
    %c0_i32_2 = arith.constant 0 : i32
    return %c0_i32, %c0_i32_0, %c0_i32_1 : i32, i32, i32
  }
  func.func @transform_6(%arg0: i32) -> (i32, i32) {
    %c0_i32 = arith.constant 0 : i32
    %c0_i32_0 = arith.constant 0 : i32
    %c0_i32_1 = arith.constant 0 : i32
    return %c0_i32, %c0_i32_0 : i32, i32
  }
  func.func @transform_7(%arg0: i32) -> (i32, i32) {
    %c0_i32 = arith.constant 0 : i32
    %c0_i32_0 = arith.constant 0 : i32
    %c0_i32_1 = arith.constant 0 : i32
    return %c0_i32, %c0_i32_0 : i32, i32
  }
  func.func @transform_8(%arg0: i32) -> (i32, i32) {
    %c0_i32 = arith.constant 0 : i32
    %c0_i32_0 = arith.constant 0 : i32
    %c0_i32_1 = arith.constant 0 : i32
    return %c0_i32, %c0_i32_0 : i32, i32
  }
  func.func @transform_9(%arg0: i32) -> (i32, i32, i32) {
    %c0_i32 = arith.constant 0 : i32
    %c0_i32_0 = arith.constant 0 : i32
    %c0_i32_1 = arith.constant 0 : i32
    %c0_i32_2 = arith.constant 0 : i32
    return %c0_i32, %c0_i32_0, %c0_i32_1 : i32, i32, i32
  }
  func.func @transform_10(%arg0: i32) -> (i32, i32, i32) {
    %c0_i32 = arith.constant 0 : i32
    %c0_i32_0 = arith.constant 0 : i32
    %c0_i32_1 = arith.constant 0 : i32
    %c0_i32_2 = arith.constant 0 : i32
    return %c0_i32, %c0_i32_0, %c0_i32_1 : i32, i32, i32
  }
}

</mosaic_0001>

<bundles_post_ra>
// kernel: bilstm_forward.1
= control target key start
LH: loop header
LB: loop body
LE: loop exit
PB: predicated region body
PF: predicated region fallthrough
CT: control target
= control target key end

     0   :  { %16 = vsyncpa [#allocation4], 0  ;;  %s2013_s19 = smov 32   ;;  %s2809_s0 = inlined_call_operand.vmem [shape: f32[80,32], index: 0, kind: input, shape index: {}]   ;;  %s2810_s1 = inlined_call_operand.vmem [shape: f32[32,256], index: 1, kind: input, shape index: {}]   ;;  %s2811_s2 = inlined_call_operand.vmem [shape: f32[64,256], index: 2, kind: input, shape index: {}]   ;;  %s2812_s3 = inlined_call_operand.vmem [shape: f32[1,256], index: 3, kind: input, shape index: {}]   ;;  %s2813_s4 = inlined_call_operand.vmem [shape: f32[2,8,32], index: 4, kind: input, shape index: {}]   ;;  %s2814_s5 = inlined_call_operand.vmem [shape: f32[2,8,32], index: 5, kind: input, shape index: {}]   ;;  %s2815_s6 = inlined_call_operand.vmem [shape: f32[64,4], index: 6, kind: input, shape index: {}]   ;;  %s2816_s7 = inlined_call_operand.vmem [shape: f32[1,4], index: 7, kind: input, shape index: {}]   ;;  %s2817_s8 = inlined_call_operand.vmem [shape: f32[8,4], index: 8, kind: output, shape index: {0}]   ;;  %s2818_s9 = inlined_call_operand.hbm [shape: f32[2,8,32], index: 9, kind: output, shape index: {1}]   ;;  %s2819_s10 = inlined_call_operand.hbm [shape: f32[2,8,32], index: 10, kind: output, shape index: {2}]  }
   0x1   :  { %v1729_v0 = vld [vmem:[%s2813_s4 + $0x8] sm:$0xff]  ;;  %v51_v1 = vld [vmem:[%s2810_s1 + $0x38] sm:$0xff] }
   0x2   :  { %v49_v2 = vld [vmem:[%s2810_s1 + $0x28] sm:$0xff]  ;;  %231 = vrot.lane.b32.xlu0 %v1729_v0, %s2013_s19  ;;  %148 = vmatpush.msra.mxu1 %v51_v1  ;;  %v47_v3 = vld [vmem:[%s2810_s1 + $0x18] sm:$0xff] }
   0x4   :  { %149 = vmatpush.msra.mxu1 %v49_v2 }
   0x5   :  { %17 = vsyncpa [#allocation6], 0  ;;  %v45_v4 = vld [vmem:[%s2810_s1 + $0x8] sm:$0xff]  ;;  %v2094_v5 = vld [vmem:[%s2809_s0] sm:$0xff]  ;;  %vm58_vm0 = vcmask 261120   ;;  %vm238_vm1 = vcmask 523264  }
   0x6   :  { %150 = vmatpush.msra.mxu1 %v47_v3  ;;  %v2101_v6 = vld [vmem:[%s2809_s0 + $0x8] sm:$0xff]  ;;  %v2108_v7 = vld [vmem:[%s2809_s0 + $0x10] sm:$0xff]  ;;  %v2120_v9 = vld [vmem:[%s2811_s2 + $0x78] sm:$0xff]  ;;  %s2014_s30 = smov 64   ;;  %s1668_s16 = sshll.u32 %s2818_s9, 4  ;;  %s1669_s16 = int_to_ptr.hbm [resolvable:$true] %s1668_s16 }
   0x7   :  { %v2115_v8 = vld [vmem:[%s2811_s2 + $0x70] sm:$0xff]  ;;  %v2125_v10 = vld [vmem:[%s2811_s2 + $0x60] sm:$0xff]  ;;  %270 = vmatpush.msra.mxu3 %v2120_v9  ;;  %v2132_v11 = vld [vmem:[%s2811_s2 + $0x68] sm:$0xff]  ;;  %s2018_s17 = smov 8   ;;  %s2019_s18 = smov [#allocation5]  }
   0x8   :  { %151 = vmatpush.msra.mxu1 %v45_v4  ;;  %250 = vmatpush.msra.mxu2 %v2115_v8  ;;  %v2141_v12 = vld [vmem:[%s2809_s0 + $0x18] sm:$0xff]  ;;  %v2148_v13 = vld [vmem:[%s2811_s2 + $0x50] sm:$0xff]  ;;  %v2158_v15 = vld [vmem:[%s2811_s2 + $0x40] sm:$0xff]  ;;  %s1679_s20 = sshll.u32 %s2019_s18, 4  ;;  %s1681_s22 = sshll.u32 %s2819_s10, 4  ;;  %s1680_s20 = int_to_ptr.vmem [resolvable:$true] %s1679_s20  ;;  %s1682_s22 = int_to_ptr.hbm [resolvable:$true] %s1681_s22 }
   0x9   :  { %1719 = vmatmul.msk.f32.vlgmr.msra.gmra.mxu1 %vm58_vm0, %v2094_v5  ;;  %271 = vmatpush.msra.mxu3 %v2132_v11  ;;  %v2153_v14 = vld [vmem:[%s2811_s2 + $0x58] sm:$0xff]  ;;  %v2165_v16 = vld [vmem:[%s2811_s2 + $0x48] sm:$0xff]  ;;  %v2170_v17 = vld [vmem:[%s2811_s2 + $0x30] sm:$0xff] }
   0xa   :  { %952 = vmatpush.msrb.mxu1 %v2120_v9  ;;  %251 = vmatpush.msra.mxu2 %v2125_v10  ;;  %v2175_v18 = vld [vmem:[%s2811_s2 + $0x38] sm:$0xff]  ;;  %v2183_v19 = vld [vmem:[%s2811_s2 + $0x20] sm:$0xff]  ;;  %v2188_v20 = vld [vmem:[%s2811_s2 + $0x28] sm:$0xff] }
   0xb   :  { %272 = vmatpush.msra.mxu3 %v2153_v14  ;;  %v2194_v21 = vld [vmem:[%s2809_s0 + $0x20] sm:$0xff]  ;;  %v50_v22 = vld [vmem:[%s2810_s1 + $0x30] sm:$0xff]  ;;  %v2214_v24 = vld [vmem:[%s2811_s2 + $0x18] sm:$0xff] }
   0xc   :  { %953 = vmatpush.msrb.mxu1 %v2132_v11  ;;  %252 = vmatpush.msra.mxu2 %v2148_v13  ;;  %v2209_v23 = vld [vmem:[%s2811_s2 + $0x10] sm:$0xff]  ;;  %v2223_v25 = vld [vmem:[%s2809_s0 + $0x28] sm:$0xff]  ;;  %v2237_v27 = vld [vmem:[%s2809_s0 + $0x38] sm:$0xff] }
   0xd   :  { %273 = vmatpush.msra.mxu3 %v2165_v16  ;;  %101 = vmatpush.msra.mxu0 %v50_v22  ;;  %v2230_v26 = vld [vmem:[%s2809_s0 + $0x30] sm:$0xff]  ;;  %v2244_v28 = vld [vmem:[%s2809_s0 + $0x40] sm:$0xff]  ;;  %v2259_v31 = vld [vmem:[%s2811_s2 + $0x8] sm:$0xff] }
   0xe   :  { %954 = vmatpush.msrb.mxu1 %v2153_v14  ;;  %253 = vmatpush.msra.mxu2 %v2158_v15  ;;  %v48_v29 = vld [vmem:[%s2810_s1 + $0x20] sm:$0xff]  ;;  %v46_v32 = vld [vmem:[%s2810_s1 + $0x10] sm:$0xff]  ;;  %v2272_v34 = vld [vmem:[%s2809_s0 + $0x48] sm:$0xff] }
   0xf   :  { %274 = vmatpush.msra.mxu3 %v2175_v18  ;;  %v2254_v30 = vld [vmem:[%s2811_s2] sm:$0xff]  ;;  %102 = vmatpush.msra.mxu0 %v48_v29  ;;  %v1730_v35 = vld [vmem:[%s2814_s5 + $0x8] sm:$0xff] }
  0x10   :  { %955 = vmatpush.msrb.mxu1 %v2165_v16  ;;  %254 = vmatpush.msra.mxu2 %v2170_v17  ;;  %v44_v33 = vld [vmem:[%s2810_s1] sm:$0xff] }
  0x11   :  { %1720 = vmatmul.msk.f32.gmra.mxu1 %vm58_vm0, %v2101_v6  ;;  %275 = vmatpush.msra.mxu3 %v2188_v20  ;;  %v227_v36 = vld [vmem:[%s2813_s4] sm:$0xff] }
  0x12   :  { %956 = vmatpush.msrb.mxu1 %v2175_v18  ;;  %255 = vmatpush.msra.mxu2 %v2183_v19  ;;  %v52_v48 = vld [vmem:[%s2812_s3] sm:$0x3] }
  0x13   :  { %276 = vmatpush.msra.mxu3 %v2214_v24  ;;  %103 = vmatpush.msra.mxu0 %v46_v32  ;;  %v2384_v49 = vperm.slane %v52_v48, 0  ;;  %v2386_v52 = vperm.slane %v52_v48, 1  ;;  %v235_v61 = vld [vmem:[%s2814_s5] sm:$0xff] }
  0x14   :  { %256 = vmatpush.msra.mxu2 %v2209_v23  ;;  %957 = vmatpush.msrb.mxu1 %v2188_v20 }
  0x15   :  { %277 = vmatpush.msra.mxu3 %v2259_v31  ;;  %104 = vmatpush.msra.mxu0 %v44_v33 }
  0x16   :  { %958 = vmatpush.msrb.mxu1 %v2214_v24  ;;  %257 = vmatpush.msra.mxu2 %v2254_v30 }
  0x17   :  { %408 = vmatpush.msrb.mxu3 %v2120_v9  ;;  %1709 = vmatmul.msk.f32.vlgmr.msra.gmra.mxu0 %vm58_vm0, %v2094_v5 }
  0x18   :  { %388 = vmatpush.msrb.mxu2 %v2115_v8  ;;  %959 = vmatpush.msrb.mxu1 %v2259_v31 }
  0x19   :  { %1721 = vmatmul.msk.f32.gmra.mxu1 %vm58_vm0, %v2108_v7  ;;  %409 = vmatpush.msrb.mxu3 %v2132_v11 }
  0x1a   :  { %389 = vmatpush.msrb.mxu2 %v2125_v10  ;;  %932 = vmatpush.msrb.mxu0 %v2115_v8 }
  0x1b   :  { %410 = vmatpush.msrb.mxu3 %v2153_v14  ;;  %1212 = vmatpush.msra.mxu1 %v2120_v9 }
  0x1c   :  { %390 = vmatpush.msrb.mxu2 %v2148_v13  ;;  %933 = vmatpush.msrb.mxu0 %v2125_v10 }
  0x1d   :  { %411 = vmatpush.msrb.mxu3 %v2165_v16  ;;  %1213 = vmatpush.msra.mxu1 %v2132_v11 }
  0x1e   :  { %391 = vmatpush.msrb.mxu2 %v2158_v15  ;;  %934 = vmatpush.msrb.mxu0 %v2148_v13 }
  0x1f   :  { %412 = vmatpush.msrb.mxu3 %v2175_v18  ;;  %1214 = vmatpush.msra.mxu1 %v2153_v14 }
  0x20   :  { %392 = vmatpush.msrb.mxu2 %v2170_v17  ;;  %935 = vmatpush.msrb.mxu0 %v2158_v15 }
  0x21   :  { %1722 = vmatmul.msk.f32.gmra.mxu1 %vm58_vm0, %v2141_v12  ;;  %413 = vmatpush.msrb.mxu3 %v2188_v20 }
  0x22   :  { %393 = vmatpush.msrb.mxu2 %v2183_v19  ;;  %1710 = vmatmul.msk.f32.gmra.mxu0 %vm58_vm0, %v2101_v6 }
  0x23   :  { %936 = vmatpush.msrb.mxu0 %v2170_v17  ;;  %414 = vmatpush.msrb.mxu3 %v2214_v24 }
  0x24   :  { %394 = vmatpush.msrb.mxu2 %v2209_v23  ;;  %1215 = vmatpush.msra.mxu1 %v2165_v16 }
  0x25   :  { %937 = vmatpush.msrb.mxu0 %v2183_v19  ;;  %415 = vmatpush.msrb.mxu3 %v2259_v31 }
  0x26   :  { %395 = vmatpush.msrb.mxu2 %v2254_v30  ;;  %1216 = vmatpush.msra.mxu1 %v2175_v18 }
  0x27   :  { %938 = vmatpush.msrb.mxu0 %v2209_v23  ;;  %342 = vrot.lane.b32.xlu2 %v1730_v35, %s2013_s19 }
  0x28   :  { %1217 = vmatpush.msra.mxu1 %v2188_v20 }
  0x29   :  { %1723 = vmatmul.msk.f32.gmra.mxu1 %vm58_vm0, %v2194_v21  ;;  %939 = vmatpush.msrb.mxu0 %v2254_v30 }
  0x2a   :  { %1711 = vmatmul.msk.f32.gmra.mxu0 %vm58_vm0, %v2108_v7  ;;  %1218 = vmatpush.msra.mxu1 %v2214_v24 }
  0x2b   :  { %1192 = vmatpush.msra.mxu0 %v2115_v8 }
  0x2c   :  { %1219 = vmatpush.msra.mxu1 %v2259_v31 }
  0x2d   :  { %1193 = vmatpush.msra.mxu0 %v2125_v10 }
  0x2f   :  { %1194 = vmatpush.msra.mxu0 %v2148_v13 }
  0x31   :  { %1724 = vmatmul.msk.f32.gmra.mxu1 %vm58_vm0, %v2223_v25  ;;  %1195 = vmatpush.msra.mxu0 %v2158_v15 }
  0x32   :  { %1712 = vmatmul.msk.f32.gmra.mxu0 %vm58_vm0, %v2141_v12 }
  0x33   :  { %1196 = vmatpush.msra.mxu0 %v2170_v17 }
  0x35   :  { %1197 = vmatpush.msra.mxu0 %v2183_v19 }
  0x37   :  { %1198 = vmatpush.msra.mxu0 %v2209_v23 }
  0x39   :  { %1725 = vmatmul.msk.f32.gmra.mxu1 %vm58_vm0, %v2230_v26  ;;  %1199 = vmatpush.msra.mxu0 %v2254_v30 }
  0x3a   :  { %1713 = vmatmul.msk.f32.gmra.mxu0 %vm58_vm0, %v2194_v21 }
  0x41   :  { %1726 = vmatmul.msk.f32.gmra.mxu1 %vm58_vm0, %v2237_v27 }
  0x42   :  { %1714 = vmatmul.msk.f32.gmra.mxu0 %vm58_vm0, %v2223_v25 }
  0x49   :  { %1727 = vmatmul.msk.f32.gmra.mxu1 %vm58_vm0, %v2244_v28 }
  0x4a   :  { %1715 = vmatmul.msk.f32.gmra.mxu0 %vm58_vm0, %v2230_v26 }
  0x51   :  { %1728 = vmatmul.msk.f32.gmra.mxu1 %vm58_vm0, %v2272_v34 }
  0x52   :  { %1716 = vmatmul.msk.f32.gmra.mxu0 %vm58_vm0, %v2237_v27 }
  0x5a   :  { %1717 = vmatmul.msk.f32.gmra.mxu0 %vm58_vm0, %v2244_v28 }
  0x62   :  { %1718 = vmatmul.msk.f32.gmra.mxu0 %vm58_vm0, %v2272_v34 }
  0x74   :  { %v232_v37 = vpop.permute.xlu0 %231 }
  0x75   :  { %v234_v38 = vsel %vm58_vm0, %v227_v36, %v232_v37 }
  0x76   :  { %1731 = vmatmul.msk.f32.vlgmr.msra.gmra.mxu2 %vm238_vm1, %v234_v38  ;;  %1732 = vmatmul.msk.f32.vlgmr.msra.gmra.mxu3 %vm238_vm1, %v234_v38 }
  0x77   :  { %524 = vmatpush.msra.mxu2 %v2115_v8  ;;  %544 = vmatpush.msra.mxu3 %v2120_v9 }
  0x79   :  { %525 = vmatpush.msra.mxu2 %v2125_v10  ;;  %545 = vmatpush.msra.mxu3 %v2132_v11 }
  0x7b   :  { %526 = vmatpush.msra.mxu2 %v2148_v13  ;;  %546 = vmatpush.msra.mxu3 %v2153_v14 }
  0x7d   :  { %527 = vmatpush.msra.mxu2 %v2158_v15  ;;  %547 = vmatpush.msra.mxu3 %v2165_v16 }
  0x7f   :  { %528 = vmatpush.msra.mxu2 %v2170_v17  ;;  %548 = vmatpush.msra.mxu3 %v2175_v18 }
  0x81   :  { %529 = vmatpush.msra.mxu2 %v2183_v19  ;;  %549 = vmatpush.msra.mxu3 %v2188_v20 }
  0x83   :  { %530 = vmatpush.msra.mxu2 %v2209_v23  ;;  %550 = vmatpush.msra.mxu3 %v2214_v24 }
  0x85   :  { %531 = vmatpush.msra.mxu2 %v2254_v30  ;;  %551 = vmatpush.msra.mxu3 %v2259_v31 }
  0x86   :  { %v2359_v39 = vpop.f32.mrf.mxu1 }
  0x8e   :  { %v2365_v40 = vpop.f32.mrf.mxu1 }
  0x94   :  { %v106_v50 = vpop.f32.mrf.mxu0 }
  0x95   :  { %v107_v53 = vadd.f32 %v106_v50, %v2384_v49 }
  0x96   :  { %v2367_v41 = vpop.f32.mrf.mxu1 }
  0x9e   :  { %v2369_v42 = vpop.f32.mrf.mxu1 }
  0xa6   :  { %v2371_v43 = vpop.f32.mrf.mxu1 }
  0xae   :  { %v2373_v44 = vpop.f32.mrf.mxu1 }
  0xb6   :  { %v2375_v45 = vpop.f32.mrf.mxu1 }
  0xbe   :  { %v2377_v46 = vpop.f32.mrf.mxu1 }
  0xc6   :  { %v2379_v47 = vpop.f32.mrf.mxu1 }
  0xce   :  { %v180_v51 = vpop.f32.mrf.mxu1 }
  0xcf   :  { %v181_v54 = vadd.f32 %v180_v51, %v2386_v52 }
  0xf9   :  { %v259_v55 = vpop.f32.mrf.mxu2  ;;  %v279_v56 = vpop.f32.mrf.mxu3 }
  0xfa   :  { %v283_v57 = vadd.f32 %v259_v55, %v107_v53  ;;  %v285_v58 = vadd.f32 %v279_v56, %v181_v54  ;;  %v343_v55 = vpop.permute.xlu2 %342 }
  0xfc   :  { %1781 = vtanh.f32 %v283_v57  ;;  %v1733_v62 = vmul.f32 -1.442695, %v283_v57  ;;  %v1734_v63 = vmul.f32 -1.442695, %v285_v58 }
  0xfd   :  { %1783 = vtanh.f32 %v285_v58 }
  0xfe   :  { %1785 = vpow2.f32 %v1733_v62 }
  0xff   :  { %1787 = vpow2.f32 %v1734_v63 }
 0x102   :  { %v1782_v59 = vpop.eup %1781 }
 0x103   :  { %v1784_v60 = vpop.eup %1783  ;;  %332 = vrot.lane.b32.xlu0 %v1782_v59, %s2014_s30 }
 0x104   :  { %347 = vrot.lane.b32.xlu1 %v1784_v60, %s2014_s30  ;;  %v1786_v0 = vpop.eup %1785 }
 0x105   :  { %v1788_v1 = vpop.eup %1787  ;;  %v289_v2 = vadd.f32 1.0, %v1786_v0 }
 0x106   :  { %v308_v3 = vadd.f32 1.0, %v1788_v1 }
 0x107   :  { %1789 = vrcp.f32 %v289_v2  ;;  %v301_v28 = vand.u32 2147483648, %v289_v2  ;;  %vm295_vm4 = vweird.f32 %v289_v2  ;;  %v299_v32 = vand.u32 2147483647, %v289_v2 }
 0x108   :  { %1791 = vrcp.f32 %v308_v3  ;;  %v320_v29 = vand.u32 2147483648, %v308_v3  ;;  %vm314_vm5 = vweird.f32 %v308_v3  ;;  %v318_v33 = vand.u32 2147483647, %v308_v3 }
 0x109   :  { %v302_v36 = vor.u32 1.1754944e-38, %v301_v28  ;;  %vm300_vm8 = vcmp.eq.f32.partialorder %v299_v32, 8.507059e+37 }
 0x10a   :  { %v321_v37 = vor.u32 1.1754944e-38, %v320_v29  ;;  %vm319_vm9 = vcmp.eq.f32.partialorder %v318_v33, 8.507059e+37 }
 0x10c   :  { %327 = vrot.lane.b32.xlu1 %v235_v61, %s2013_s19 }
 0x10d   :  { %v1790_v4 = vpop.eup %1789 }
 0x10e   :  { %v1792_v5 = vpop.eup %1791  ;;  %v291_v6 = vmul.f32 %v1790_v4, %v289_v2  ;;  %vm296_vm2 = vweird.f32 %v1790_v4 }
 0x10f   :  { %v310_v7 = vmul.f32 %v1792_v5, %v308_v3  ;;  %vm315_vm3 = vweird.f32 %v1792_v5  ;;  %vm297_vm6 = vmor %vm295_vm4, %vm296_vm2 }
 0x110   :  { %v292_v12 = vsub.f32 1.0, %v291_v6  ;;  %vm316_vm7 = vmor %vm314_vm5, %vm315_vm3 }
 0x111   :  { %v311_v21 = vsub.f32 1.0, %v310_v7 }
 0x112   :  { %v293_v22 = vmul.f32 %v1790_v4, %v292_v12  ;;  %v109_v12 = vpop.f32.mrf.mxu0 }
 0x113   :  { %v312_v25 = vmul.f32 %v1792_v5, %v311_v21  ;;  %v110_v21 = vadd.f32 %v109_v12, %v2384_v49 }
 0x114   :  { %v294_v26 = vadd.f32 %v1790_v4, %v293_v22  ;;  %v178_v22 = vadd.f32 %v2379_v47, %v2386_v52 }
 0x115   :  { %v313_v27 = vadd.f32 %v1792_v5, %v312_v25 }
 0x116   :  { %v298_v34 = vsel %vm297_vm6, %v1790_v4, %v294_v26 }
 0x117   :  { %v317_v35 = vsel %vm316_vm7, %v1792_v5, %v313_v27  ;;  %v303_v48 = vsel %vm300_vm8, %v302_v36, %v298_v34 }
 0x118   :  { %v322_v50 = vsel %vm319_vm9, %v321_v37, %v317_v35 }
 0x119   :  { %v345_v61 = vmul.f32 %v343_v55, %v322_v50 }
 0x175   :  { %v333_v38 = vpop.permute.xlu0 %332 }
 0x176   :  { %v348_v51 = vpop.permute.xlu1 %347  ;;  %v335_v53 = vmul.f32 %v333_v38, %v303_v48 }
 0x177   :  { %v350_v54 = vmul.f32 %v348_v51, %v322_v50 }
 0x178   :  { %337 = vrot.lane.b32.xlu2 %v335_v53, %s2013_s19 }
 0x179   :  { %352 = vrot.lane.b32.xlu0 %v350_v54, %s2013_s19 }
 0x17e   :  { %v328_v56 = vpop.permute.xlu1 %327 }
 0x17f   :  { %v330_v57 = vmul.f32 %v328_v56, %v303_v48 }
 0x1d2   :  { %v338_v58 = vpop.permute.xlu2 %337 }
 0x1d3   :  { %v2398_v59 = vadd.f32 %v338_v58, %v330_v57 }
 0x1d5   :  { %1793 = vtanh.f32 %v2398_v59 }
 0x1db   :  { %v1794_v60 = vpop.eup %1793 }
 0x1dc   :  { %358 = vrot.lane.b32.xlu1 %v1794_v60, %s2014_s30 }
 0x1eb   :  { %v353_v62 = vpop.permute.xlu0 %352 }
 0x1ec   :  { %v2402_v63 = vadd.f32 %v353_v62, %v345_v61 }
 0x1ee   :  { %1795 = vtanh.f32 %v2402_v63 }
 0x1f4   :  { %v1796_v0 = vpop.eup %1795 }
 0x1f5   :  { %364 = vrot.lane.b32.xlu2 %v1796_v0, %s2014_s30 }
 0x24e   :  { %v359_v1 = vpop.permute.xlu1 %358 }
 0x24f   :  { %v365_v2 = vpop.permute.xlu2 %364  ;;  %v361_v3 = vmul.f32 %v359_v1, %v303_v48 }
 0x250   :  { %v367_v4 = vmul.f32 %v365_v2, %v322_v50 }
 0x251   :  { %369 = vrot.lane.b32.xlu0 %v361_v3, %s2013_s19 }
 0x252   :  { %373 = vrot.lane.b32.xlu1 %v367_v4, %s2014_s30 }
 0x2c3   :  { %v370_v5 = vpop.permute.xlu0 %369 }
 0x2c4   :  { %v374_v6 = vpop.permute.xlu1 %373 }
 0x2c5   :  { %v2409_v7 = vsel %vm58_vm0, %v370_v5, %v374_v6 }
 0x2c6   :  { %1735 = vmatmul.msk.f32.vlgmr.msrb.gmra.mxu2 %vm238_vm1, %v2409_v7  ;;  %1736 = vmatmul.msk.f32.vlgmr.msrb.gmra.mxu3 %vm238_vm1, %v2409_v7 }
 0x2c7   :  { %660 = vmatpush.msrb.mxu2 %v2115_v8  ;;  %680 = vmatpush.msrb.mxu3 %v2120_v9 }
 0x2c9   :  { %661 = vmatpush.msrb.mxu2 %v2125_v10  ;;  %681 = vmatpush.msrb.mxu3 %v2132_v11 }
 0x2cb   :  { %662 = vmatpush.msrb.mxu2 %v2148_v13  ;;  %682 = vmatpush.msrb.mxu3 %v2153_v14 }
 0x2cd   :  { %663 = vmatpush.msrb.mxu2 %v2158_v15  ;;  %683 = vmatpush.msrb.mxu3 %v2165_v16 }
 0x2cf   :  { %664 = vmatpush.msrb.mxu2 %v2170_v17  ;;  %684 = vmatpush.msrb.mxu3 %v2175_v18 }
 0x2d1   :  { %665 = vmatpush.msrb.mxu2 %v2183_v19  ;;  %685 = vmatpush.msrb.mxu3 %v2188_v20 }
 0x2d3   :  { %666 = vmatpush.msrb.mxu2 %v2209_v23  ;;  %686 = vmatpush.msrb.mxu3 %v2214_v24 }
 0x2d5   :  { %667 = vmatpush.msrb.mxu2 %v2254_v30  ;;  %687 = vmatpush.msrb.mxu3 %v2259_v31 }
 0x349   :  { %v397_v25 = vpop.f32.mrf.mxu2  ;;  %v417_v26 = vpop.f32.mrf.mxu3 }
 0x34a   :  { %v424_v27 = vadd.f32 %v397_v25, %v110_v21  ;;  %v429_v28 = vadd.f32 %v417_v26, %v178_v22 }
 0x34c   :  { %1797 = vtanh.f32 %v424_v27  ;;  %v1737_v33 = vmul.f32 -1.442695, %v424_v27  ;;  %v1738_v37 = vmul.f32 -1.442695, %v429_v28 }
 0x34d   :  { %1799 = vtanh.f32 %v429_v28 }
 0x34e   :  { %1801 = vpow2.f32 %v1737_v33 }
 0x352   :  { %v1798_v29 = vpop.eup %1797 }
 0x353   :  { %v1800_v32 = vpop.eup %1799  ;;  %472 = vrot.lane.b32.xlu2 %v1798_v29, %s2014_s30 }
 0x354   :  { %483 = vrot.lane.b32.xlu0 %v1800_v32, %s2014_s30  ;;  %v1802_v34 = vpop.eup %1801 }
 0x355   :  { %v433_v35 = vadd.f32 1.0, %v1802_v34 }
 0x357   :  { %1803 = vrcp.f32 %v433_v35  ;;  %v445_v54 = vand.u32 2147483648, %v433_v35  ;;  %vm439_vm11 = vweird.f32 %v433_v35  ;;  %v443_v55 = vand.u32 2147483647, %v433_v35 }
 0x358   :  { %1805 = vpow2.f32 %v1738_v37 }
 0x359   :  { %v446_v57 = vor.u32 1.1754944e-38, %v445_v54  ;;  %vm444_vm13 = vcmp.eq.f32.partialorder %v443_v55, 8.507059e+37 }
 0x35d   :  { %v1804_v36 = vpop.eup %1803 }
 0x35e   :  { %v435_v47 = vmul.f32 %v1804_v36, %v433_v35  ;;  %v1806_v50 = vpop.eup %1805  ;;  %vm440_vm10 = vweird.f32 %v1804_v36 }
 0x35f   :  { %v452_v51 = vadd.f32 1.0, %v1806_v50  ;;  %vm441_vm12 = vmor %vm439_vm11, %vm440_vm10  ;;  %v112_v50 = vpop.f32.mrf.mxu0 }
 0x360   :  { %v436_v38 = vsub.f32 1.0, %v435_v47 }
 0x361   :  { %1807 = vrcp.f32 %v452_v51  ;;  %v464_v4 = vand.u32 2147483648, %v452_v51  ;;  %vm458_vm15 = vweird.f32 %v452_v51  ;;  %v462_v5 = vand.u32 2147483647, %v452_v51 }
 0x362   :  { %v437_v48 = vmul.f32 %v1804_v36, %v436_v38 }
 0x363   :  { %v465_v12 = vor.u32 1.1754944e-38, %v464_v4  ;;  %vm463_vm3 = vcmp.eq.f32.partialorder %v462_v5, 8.507059e+37 }
 0x364   :  { %v438_v53 = vadd.f32 %v1804_v36, %v437_v48 }
 0x366   :  { %v442_v56 = vsel %vm441_vm12, %v1804_v36, %v438_v53  ;;  %v175_v53 = vadd.f32 %v2377_v46, %v2386_v52 }
 0x367   :  { %v447_v60 = vsel %vm444_vm13, %v446_v57, %v442_v56  ;;  %v1808_v62 = vpop.eup %1807 }
 0x368   :  { %v454_v0 = vmul.f32 %v1808_v62, %v452_v51  ;;  %vm459_vm14 = vweird.f32 %v1808_v62  ;;  %v470_v26 = vmul.f32 %v447_v60, %v2398_v59  ;;  %v113_v51 = vadd.f32 %v112_v50, %v2384_v49 }
 0x369   :  { %vm460_vm2 = vmor %vm458_vm15, %vm459_vm14 }
 0x36a   :  { %v455_v1 = vsub.f32 1.0, %v454_v0 }
 0x36c   :  { %v456_v2 = vmul.f32 %v1808_v62, %v455_v1 }
 0x36e   :  { %v457_v3 = vadd.f32 %v1808_v62, %v456_v2 }
 0x370   :  { %v461_v6 = vsel %vm460_vm2, %v1808_v62, %v457_v3 }
 0x371   :  { %v466_v22 = vsel %vm463_vm3, %v465_v12, %v461_v6 }
 0x372   :  { %v481_v27 = vmul.f32 %v466_v22, %v2402_v63 }
 0x3ad   :  { %v473_v58 = vpop.permute.xlu2 %472 }
 0x3ae   :  { %v475_v61 = vmul.f32 %v473_v58, %v447_v60 }
 0x3b0   :  { %477 = vrot.lane.b32.xlu1 %v475_v61, %s2013_s19 }
 0x3c6   :  { %v484_v21 = vpop.permute.xlu0 %483 }
 0x3c7   :  { %v486_v25 = vmul.f32 %v484_v21, %v466_v22 }
 0x3c9   :  { %488 = vrot.lane.b32.xlu2 %v486_v25, %s2013_s19 }
 0x422   :  { %v478_v28 = vpop.permute.xlu1 %477 }
 0x423   :  { %v489_v29 = vpop.permute.xlu2 %488  ;;  %v2440_v32 = vadd.f32 %v478_v28, %v470_v26 }
 0x424   :  { %v2442_v33 = vadd.f32 %v489_v29, %v481_v27 }
 0x425   :  { %1809 = vtanh.f32 %v2440_v32 }
 0x426   :  { %1811 = vtanh.f32 %v2442_v33 }
 0x42b   :  { %v1810_v34 = vpop.eup %1809 }
 0x42c   :  { %v1812_v35 = vpop.eup %1811  ;;  %494 = vrot.lane.b32.xlu0 %v1810_v34, %s2014_s30 }
 0x42d   :  { %500 = vrot.lane.b32.xlu1 %v1812_v35, %s2014_s30 }
 0x49e   :  { %v495_v36 = vpop.permute.xlu0 %494 }
 0x49f   :  { %v501_v59 = vpop.permute.xlu1 %500  ;;  %v497_v37 = vmul.f32 %v495_v36, %v447_v60 }
 0x4a0   :  { %v503_v63 = vmul.f32 %v501_v59, %v466_v22 }
 0x4a1   :  { %505 = vrot.lane.b32.xlu2 %v497_v37, %s2013_s19 }
 0x4a2   :  { %509 = vrot.lane.b32.xlu0 %v503_v63, %s2014_s30 }
 0x4fb   :  { %v506_v47 = vpop.permute.xlu2 %505 }
 0x514   :  { %v510_v38 = vpop.permute.xlu0 %509 }
 0x515   :  { %v512_v48 = vsel %vm58_vm0, %v506_v47, %v510_v38 }
 0x516   :  { %1739 = vmatmul.msk.f32.vlgmr.msra.gmra.mxu2 %vm238_vm1, %v512_v48  ;;  %1740 = vmatmul.msk.f32.vlgmr.msra.gmra.mxu3 %vm238_vm1, %v512_v48 }
 0x517   :  { %796 = vmatpush.msra.mxu2 %v2115_v8  ;;  %816 = vmatpush.msra.mxu3 %v2120_v9 }
 0x519   :  { %797 = vmatpush.msra.mxu2 %v2125_v10  ;;  %817 = vmatpush.msra.mxu3 %v2132_v11 }
 0x51b   :  { %798 = vmatpush.msra.mxu2 %v2148_v13  ;;  %818 = vmatpush.msra.mxu3 %v2153_v14 }
 0x51d   :  { %799 = vmatpush.msra.mxu2 %v2158_v15  ;;  %819 = vmatpush.msra.mxu3 %v2165_v16 }
 0x51f   :  { %800 = vmatpush.msra.mxu2 %v2170_v17  ;;  %820 = vmatpush.msra.mxu3 %v2175_v18 }
 0x521   :  { %801 = vmatpush.msra.mxu2 %v2183_v19  ;;  %821 = vmatpush.msra.mxu3 %v2188_v20 }
 0x523   :  { %802 = vmatpush.msra.mxu2 %v2209_v23  ;;  %822 = vmatpush.msra.mxu3 %v2214_v24 }
 0x525   :  { %803 = vmatpush.msra.mxu2 %v2254_v30  ;;  %823 = vmatpush.msra.mxu3 %v2259_v31 }
 0x599   :  { %v533_v54 = vpop.f32.mrf.mxu2  ;;  %v553_v55 = vpop.f32.mrf.mxu3 }
 0x59a   :  { %v560_v56 = vadd.f32 %v533_v54, %v113_v51  ;;  %v565_v57 = vadd.f32 %v553_v55, %v175_v53 }
 0x59c   :  { %1813 = vtanh.f32 %v560_v56  ;;  %v1742_v61 = vmul.f32 -1.442695, %v565_v57  ;;  %v1741_v2 = vmul.f32 -1.442695, %v560_v56 }
 0x59d   :  { %1815 = vtanh.f32 %v565_v57 }
 0x59e   :  { %1817 = vpow2.f32 %v1742_v61 }
 0x5a2   :  { %v1814_v58 = vpop.eup %1813 }
 0x5a3   :  { %v1816_v60 = vpop.eup %1815  ;;  %608 = vrot.lane.b32.xlu1 %v1814_v58, %s2014_s30 }
 0x5a4   :  { %619 = vrot.lane.b32.xlu2 %v1816_v60, %s2014_s30  ;;  %v1818_v62 = vpop.eup %1817 }
 0x5a5   :  { %v588_v0 = vadd.f32 1.0, %v1818_v62 }
 0x5a7   :  { %1819 = vrcp.f32 %v588_v0  ;;  %v600_v21 = vand.u32 2147483648, %v588_v0  ;;  %vm594_vm5 = vweird.f32 %v588_v0  ;;  %v598_v22 = vand.u32 2147483647, %v588_v0 }
 0x5a8   :  { %1821 = vpow2.f32 %v1741_v2 }
 0x5a9   :  { %v601_v26 = vor.u32 1.1754944e-38, %v600_v21  ;;  %vm599_vm7 = vcmp.eq.f32.partialorder %v598_v22, 8.507059e+37 }
 0x5ad   :  { %v1820_v1 = vpop.eup %1819 }
 0x5ae   :  { %v590_v46 = vmul.f32 %v1820_v1, %v588_v0  ;;  %v1822_v4 = vpop.eup %1821  ;;  %vm595_vm4 = vweird.f32 %v1820_v1 }
 0x5af   :  { %v569_v6 = vadd.f32 1.0, %v1822_v4  ;;  %vm596_vm6 = vmor %vm594_vm5, %vm595_vm4 }
 0x5b0   :  { %v591_v3 = vsub.f32 1.0, %v590_v46 }
 0x5b1   :  { %1823 = vrcp.f32 %v569_v6  ;;  %v581_v63 = vand.u32 2147483648, %v569_v6  ;;  %vm575_vm9 = vweird.f32 %v569_v6  ;;  %v579_v47 = vand.u32 2147483647, %v569_v6 }
 0x5b2   :  { %v592_v5 = vmul.f32 %v1820_v1, %v591_v3 }
 0x5b3   :  { %v582_v48 = vor.u32 1.1754944e-38, %v581_v63  ;;  %vm580_vm11 = vcmp.eq.f32.partialorder %v579_v47, 8.507059e+37 }
 0x5b4   :  { %v593_v12 = vadd.f32 %v1820_v1, %v592_v5 }
 0x5b6   :  { %v597_v25 = vsel %vm596_vm6, %v1820_v1, %v593_v12 }
 0x5b7   :  { %v602_v28 = vsel %vm599_vm7, %v601_v26, %v597_v25  ;;  %v1824_v29 = vpop.eup %1823 }
 0x5b8   :  { %v571_v35 = vmul.f32 %v1824_v29, %v569_v6  ;;  %vm576_vm8 = vweird.f32 %v1824_v29  ;;  %v617_v54 = vmul.f32 %v602_v28, %v2442_v33 }
 0x5b9   :  { %vm577_vm10 = vmor %vm575_vm9, %vm576_vm8 }
 0x5ba   :  { %v572_v36 = vsub.f32 1.0, %v571_v35 }
 0x5bc   :  { %v573_v59 = vmul.f32 %v1824_v29, %v572_v36 }
 0x5be   :  { %v574_v37 = vadd.f32 %v1824_v29, %v573_v59 }
 0x5c0   :  { %v578_v38 = vsel %vm577_vm10, %v1824_v29, %v574_v37 }
 0x5c1   :  { %v583_v51 = vsel %vm580_vm11, %v582_v48, %v578_v38 }
 0x5c2   :  { %v606_v58 = vmul.f32 %v583_v51, %v2440_v32 }
 0x5fe   :  { %v620_v27 = vpop.permute.xlu2 %619 }
 0x5ff   :  { %v622_v34 = vmul.f32 %v620_v27, %v602_v28 }
 0x601   :  { %624 = vrot.lane.b32.xlu1 %v622_v34, %s2013_s19 }
 0x615   :  { %v609_v50 = vpop.permute.xlu1 %608 }
 0x616   :  { %v611_v53 = vmul.f32 %v609_v50, %v583_v51 }
 0x618   :  { %613 = vrot.lane.b32.xlu0 %v611_v53, %s2013_s19 }
 0x673   :  { %v625_v55 = vpop.permute.xlu1 %624 }
 0x674   :  { %v2477_v56 = vadd.f32 %v625_v55, %v617_v54 }
 0x676   :  { %1825 = vtanh.f32 %v2477_v56 }
 0x67c   :  { %v1826_v57 = vpop.eup %1825 }
 0x67d   :  { %636 = vrot.lane.b32.xlu0 %v1826_v57, %s2014_s30 }
 0x68a   :  { %v614_v60 = vpop.permute.xlu0 %613 }
 0x68b   :  { %v2482_v61 = vadd.f32 %v614_v60, %v606_v58 }
 0x68d   :  { %1827 = vtanh.f32 %v2482_v61 }
 0x693   :  { %v1828_v62 = vpop.eup %1827 }
 0x694   :  { %630 = vrot.lane.b32.xlu2 %v1828_v62, %s2014_s30 }
 0x6ee   :  { %v631_v0 = vpop.permute.xlu2 %630 }
 0x6ef   :  { %v637_v33 = vpop.permute.xlu0 %636  ;;  %v633_v1 = vmul.f32 %v631_v0, %v583_v51 }
 0x6f0   :  { %v639_v2 = vmul.f32 %v637_v33, %v602_v28 }
 0x6f1   :  { %641 = vrot.lane.b32.xlu1 %v633_v1, %s2013_s19 }
 0x6f2   :  { %645 = vrot.lane.b32.xlu2 %v639_v2, %s2014_s30 }
 0x74c   :  { %v646_v46 = vpop.permute.xlu2 %645 }
 0x763   :  { %v642_v3 = vpop.permute.xlu1 %641 }
 0x764   :  { %v648_v32 = vsel %vm58_vm0, %v642_v3, %v646_v46 }
 0x765   :  { %1743 = vmatmul.msk.f32.vlgmr.msrb.gmra.mxu2 %vm238_vm1, %v648_v32  ;;  %1744 = vmatmul.msk.f32.vlgmr.msrb.gmra.mxu3 %vm238_vm1, %v648_v32 }
 0x766   :  { %1062 = vmatpush.msrb.mxu2 %v2115_v8  ;;  %1082 = vmatpush.msrb.mxu3 %v2120_v9  ;;  %v115_v8 = vpop.f32.mrf.mxu0 }
 0x767   :  { %v116_v9 = vadd.f32 %v115_v8, %v2384_v49 }
 0x768   :  { %1063 = vmatpush.msrb.mxu2 %v2125_v10  ;;  %1083 = vmatpush.msrb.mxu3 %v2132_v11  ;;  %v172_v10 = vadd.f32 %v2375_v45, %v2386_v52 }
 0x76a   :  { %1064 = vmatpush.msrb.mxu2 %v2148_v13  ;;  %1084 = vmatpush.msrb.mxu3 %v2153_v14 }
 0x76c   :  { %1065 = vmatpush.msrb.mxu2 %v2158_v15  ;;  %1085 = vmatpush.msrb.mxu3 %v2165_v16 }
 0x76e   :  { %1066 = vmatpush.msrb.mxu2 %v2170_v17  ;;  %1086 = vmatpush.msrb.mxu3 %v2175_v18 }
 0x770   :  { %1067 = vmatpush.msrb.mxu2 %v2183_v19  ;;  %1087 = vmatpush.msrb.mxu3 %v2188_v20 }
 0x772   :  { %1068 = vmatpush.msrb.mxu2 %v2209_v23  ;;  %1088 = vmatpush.msrb.mxu3 %v2214_v24 }
 0x774   :  { %1069 = vmatpush.msrb.mxu2 %v2254_v30  ;;  %1089 = vmatpush.msrb.mxu3 %v2259_v31 }
 0x7e8   :  { %v669_v11 = vpop.f32.mrf.mxu2  ;;  %v689_v13 = vpop.f32.mrf.mxu3 }
 0x7e9   :  { %v696_v14 = vadd.f32 %v669_v11, %v116_v9  ;;  %v701_v15 = vadd.f32 %v689_v13, %v172_v10 }
 0x7eb   :  { %1829 = vtanh.f32 %v696_v14  ;;  %v1745_v18 = vmul.f32 -1.442695, %v696_v14  ;;  %v1746_v4 = vmul.f32 -1.442695, %v701_v15  ;;  %v2532_v14 = vld [vmem:[%s2811_s2 + $0x70] sm:$0xff] }
 0x7ec   :  { %1831 = vtanh.f32 %v701_v15  ;;  %v2538_v15 = vld [vmem:[%s2811_s2 + $0x78] sm:$0xff] }
 0x7ed   :  { %1833 = vpow2.f32 %v1745_v18  ;;  %v2556_v18 = vld [vmem:[%s2811_s2 + $0x50] sm:$0xff] }
 0x7ee   :  { %1835 = vpow2.f32 %v1746_v4  ;;  %v2562_v4 = vld [vmem:[%s2811_s2 + $0x58] sm:$0xff] }
 0x7f1   :  { %v1830_v16 = vpop.eup %1829 }
 0x7f2   :  { %v1832_v17 = vpop.eup %1831  ;;  %744 = vrot.lane.b32.xlu0 %v1830_v16, %s2014_s30  ;;  %v2544_v16 = vld [vmem:[%s2811_s2 + $0x60] sm:$0xff] }
 0x7f3   :  { %755 = vrot.lane.b32.xlu1 %v1832_v17, %s2014_s30  ;;  %v1834_v5 = vpop.eup %1833  ;;  %v2550_v17 = vld [vmem:[%s2811_s2 + $0x68] sm:$0xff] }
 0x7f4   :  { %v1836_v6 = vpop.eup %1835  ;;  %v705_v12 = vadd.f32 1.0, %v1834_v5  ;;  %v2568_v5 = vld [vmem:[%s2811_s2 + $0x40] sm:$0xff] }
 0x7f5   :  { %v724_v45 = vadd.f32 1.0, %v1836_v6  ;;  %v2574_v6 = vld [vmem:[%s2811_s2 + $0x48] sm:$0xff] }
 0x7f6   :  { %1837 = vrcp.f32 %v705_v12  ;;  %v717_v59 = vand.u32 2147483648, %v705_v12  ;;  %vm711_vm14 = vweird.f32 %v705_v12  ;;  %v715_v63 = vand.u32 2147483647, %v705_v12 }
 0x7f7   :  { %1839 = vrcp.f32 %v724_v45  ;;  %v736_v37 = vand.u32 2147483648, %v724_v45  ;;  %vm730_vm15 = vweird.f32 %v724_v45  ;;  %v734_v47 = vand.u32 2147483647, %v724_v45 }
 0x7f8   :  { %v718_v50 = vor.u32 1.1754944e-38, %v717_v59  ;;  %vm716_vm4 = vcmp.eq.f32.partialorder %v715_v63, 8.507059e+37 }
 0x7f9   :  { %v737_v51 = vor.u32 1.1754944e-38, %v736_v37  ;;  %vm735_vm5 = vcmp.eq.f32.partialorder %v734_v47, 8.507059e+37 }
 0x7fc   :  { %v1838_v21 = vpop.eup %1837 }
 0x7fd   :  { %v1840_v22 = vpop.eup %1839  ;;  %v707_v25 = vmul.f32 %v1838_v21, %v705_v12  ;;  %vm712_vm12 = vweird.f32 %v1838_v21  ;;  %v2580_v12 = vld [vmem:[%s2811_s2 + $0x30] sm:$0xff] }
 0x7fe   :  { %v726_v26 = vmul.f32 %v1840_v22, %v724_v45  ;;  %vm731_vm13 = vweird.f32 %v1840_v22  ;;  %vm713_vm2 = vmor %vm711_vm14, %vm712_vm12  ;;  %v2586_v45 = vld [vmem:[%s2811_s2 + $0x38] sm:$0xff] }
 0x7ff   :  { %v708_v27 = vsub.f32 1.0, %v707_v25  ;;  %vm732_vm3 = vmor %vm730_vm15, %vm731_vm13  ;;  %v169_v25 = vadd.f32 %v2373_v44, %v2386_v52 }
 0x800   :  { %v727_v28 = vsub.f32 1.0, %v726_v26 }
 0x801   :  { %v709_v29 = vmul.f32 %v1838_v21, %v708_v27 }
 0x802   :  { %v728_v34 = vmul.f32 %v1840_v22, %v727_v28 }
 0x803   :  { %v710_v35 = vadd.f32 %v1838_v21, %v709_v29 }
 0x804   :  { %v729_v36 = vadd.f32 %v1840_v22, %v728_v34 }
 0x805   :  { %v714_v38 = vsel %vm713_vm2, %v1838_v21, %v710_v35  ;;  %v118_v21 = vpop.f32.mrf.mxu0 }
 0x806   :  { %v733_v48 = vsel %vm732_vm3, %v1840_v22, %v729_v36  ;;  %v719_v54 = vsel %vm716_vm4, %v718_v50, %v714_v38  ;;  %v119_v22 = vadd.f32 %v118_v21, %v2384_v49 }
 0x807   :  { %v738_v57 = vsel %vm735_vm5, %v737_v51, %v733_v48  ;;  %v742_v62 = vmul.f32 %v719_v54, %v2482_v61 }
 0x808   :  { %v753_v2 = vmul.f32 %v738_v57, %v2477_v56 }
 0x864   :  { %v745_v53 = vpop.permute.xlu0 %744 }
 0x865   :  { %v756_v55 = vpop.permute.xlu1 %755  ;;  %v747_v58 = vmul.f32 %v745_v53, %v719_v54 }
 0x866   :  { %v758_v60 = vmul.f32 %v756_v55, %v738_v57 }
 0x867   :  { %749 = vrot.lane.b32.xlu2 %v747_v58, %s2013_s19 }
 0x868   :  { %760 = vrot.lane.b32.xlu0 %v758_v60, %s2013_s19 }
 0x8c1   :  { %v750_v0 = vpop.permute.xlu2 %749 }
 0x8c2   :  { %v2515_v33 = vadd.f32 %v750_v0, %v742_v62 }
 0x8c4   :  { %1841 = vtanh.f32 %v2515_v33 }
 0x8ca   :  { %v1842_v1 = vpop.eup %1841 }
 0x8cb   :  { %766 = vrot.lane.b32.xlu1 %v1842_v1, %s2014_s30 }
 0x8da   :  { %v761_v46 = vpop.permute.xlu0 %760 }
 0x8db   :  { %v2520_v3 = vadd.f32 %v761_v46, %v753_v2 }
 0x8dd   :  { %1843 = vtanh.f32 %v2520_v3 }
 0x8e3   :  { %v1844_v32 = vpop.eup %1843 }
 0x8e4   :  { %772 = vrot.lane.b32.xlu2 %v1844_v32, %s2014_s30 }
 0x93d   :  { %v767_v8 = vpop.permute.xlu1 %766 }
 0x93e   :  { %v773_v61 = vpop.permute.xlu2 %772  ;;  %v769_v9 = vmul.f32 %v767_v8, %v719_v54 }
 0x93f   :  { %v775_v10 = vmul.f32 %v773_v61, %v738_v57 }
 0x940   :  { %777 = vrot.lane.b32.xlu0 %v769_v9, %s2013_s19 }
 0x941   :  { %781 = vrot.lane.b32.xlu1 %v775_v10, %s2014_s30 }
 0x9b2   :  { %v778_v11 = vpop.permute.xlu0 %777 }
 0x9b3   :  { %v782_v13 = vpop.permute.xlu1 %781 }
 0x9b4   :  { %v784_v56 = vsel %vm58_vm0, %v778_v11, %v782_v13 }
 0x9b5   :  { %1747 = vmatmul.msk.f32.vlgmr.msra.gmra.mxu2 %vm238_vm1, %v784_v56  ;;  %1748 = vmatmul.msk.f32.vlgmr.msra.gmra.mxu3 %vm238_vm1, %v784_v56 }
 0x9b6   :  { %1322 = vmatpush.msra.mxu2 %v2532_v14  ;;  %1342 = vmatpush.msra.mxu3 %v2538_v15 }
 0x9b8   :  { %1323 = vmatpush.msra.mxu2 %v2544_v16  ;;  %1343 = vmatpush.msra.mxu3 %v2550_v17 }
 0x9ba   :  { %1324 = vmatpush.msra.mxu2 %v2556_v18  ;;  %1344 = vmatpush.msra.mxu3 %v2562_v4 }
 0x9bc   :  { %1325 = vmatpush.msra.mxu2 %v2568_v5  ;;  %1345 = vmatpush.msra.mxu3 %v2574_v6 }
 0x9be   :  { %1326 = vmatpush.msra.mxu2 %v2580_v12  ;;  %1346 = vmatpush.msra.mxu3 %v2586_v45 }
 0x9c0   :  { %1327 = vmatpush.msra.mxu2 %v2183_v19  ;;  %1347 = vmatpush.msra.mxu3 %v2188_v20 }
 0x9c2   :  { %1328 = vmatpush.msra.mxu2 %v2209_v23  ;;  %1348 = vmatpush.msra.mxu3 %v2214_v24 }
 0x9c4   :  { %1329 = vmatpush.msra.mxu2 %v2254_v30  ;;  %1349 = vmatpush.msra.mxu3 %v2259_v31 }
 0xa38   :  { %v805_v26 = vpop.f32.mrf.mxu2  ;;  %v825_v27 = vpop.f32.mrf.mxu3 }
 0xa39   :  { %v832_v28 = vadd.f32 %v805_v26, %v119_v22  ;;  %v837_v19 = vadd.f32 %v825_v27, %v169_v25 }
 0xa3b   :  { %1845 = vtanh.f32 %v832_v28  ;;  %v1749_v24 = vmul.f32 -1.442695, %v832_v28  ;;  %v1750_v34 = vmul.f32 -1.442695, %v837_v19 }
 0xa3c   :  { %1847 = vtanh.f32 %v837_v19 }
 0xa3d   :  { %1849 = vpow2.f32 %v1749_v24  ;;  %v166_v24 = vadd.f32 %v2371_v43, %v2386_v52 }
 0xa41   :  { %v1846_v20 = vpop.eup %1845 }
 0xa42   :  { %v1848_v23 = vpop.eup %1847  ;;  %880 = vrot.lane.b32.xlu2 %v1846_v20, %s2014_s30 }
 0xa43   :  { %891 = vrot.lane.b32.xlu0 %v1848_v23, %s2014_s30  ;;  %v1850_v30 = vpop.eup %1849 }
 0xa44   :  { %v841_v31 = vadd.f32 1.0, %v1850_v30 }
 0xa46   :  { %1851 = vrcp.f32 %v841_v31  ;;  %v853_v47 = vand.u32 2147483648, %v841_v31  ;;  %vm847_vm7 = vweird.f32 %v841_v31  ;;  %v851_v38 = vand.u32 2147483647, %v841_v31 }
 0xa47   :  { %1853 = vpow2.f32 %v1750_v34 }
 0xa48   :  { %v854_v50 = vor.u32 1.1754944e-38, %v853_v47  ;;  %vm852_vm9 = vcmp.eq.f32.partialorder %v851_v38, 8.507059e+37 }
 0xa4c   :  { %v1852_v29 = vpop.eup %1851 }
 0xa4d   :  { %v843_v44 = vmul.f32 %v1852_v29, %v841_v31  ;;  %v1854_v59 = vpop.eup %1853  ;;  %vm848_vm6 = vweird.f32 %v1852_v29 }
 0xa4e   :  { %v860_v37 = vadd.f32 1.0, %v1854_v59  ;;  %vm849_vm8 = vmor %vm847_vm7, %vm848_vm6 }
 0xa4f   :  { %v844_v35 = vsub.f32 1.0, %v843_v44 }
 0xa50   :  { %1855 = vrcp.f32 %v860_v37  ;;  %v872_v0 = vand.u32 2147483648, %v860_v37  ;;  %vm866_vm11 = vweird.f32 %v860_v37  ;;  %v870_v1 = vand.u32 2147483647, %v860_v37 }
 0xa51   :  { %v845_v36 = vmul.f32 %v1852_v29, %v844_v35 }
 0xa52   :  { %v873_v46 = vor.u32 1.1754944e-38, %v872_v0  ;;  %vm871_vm13 = vcmp.eq.f32.partialorder %v870_v1, 8.507059e+37 }
 0xa53   :  { %v846_v63 = vadd.f32 %v1852_v29, %v845_v36 }
 0xa55   :  { %v850_v48 = vsel %vm849_vm8, %v1852_v29, %v846_v63 }
 0xa56   :  { %v855_v53 = vsel %vm852_vm9, %v854_v50, %v850_v48  ;;  %v1856_v55 = vpop.eup %1855 }
 0xa57   :  { %v862_v57 = vmul.f32 %v1856_v55, %v860_v37  ;;  %vm867_vm10 = vweird.f32 %v1856_v55  ;;  %v878_v9 = vmul.f32 %v855_v53, %v2515_v33 }
 0xa58   :  { %vm868_vm12 = vmor %vm866_vm11, %vm867_vm10 }
 0xa59   :  { %v863_v58 = vsub.f32 1.0, %v862_v57 }
 0xa5b   :  { %v864_v60 = vmul.f32 %v1856_v55, %v863_v58 }
 0xa5d   :  { %v865_v62 = vadd.f32 %v1856_v55, %v864_v60 }
 0xa5f   :  { %v869_v2 = vsel %vm868_vm12, %v1856_v55, %v865_v62 }
 0xa60   :  { %v874_v8 = vsel %vm871_vm13, %v873_v46, %v869_v2 }
 0xa61   :  { %v889_v10 = vmul.f32 %v874_v8, %v2520_v3 }
 0xa9c   :  { %v881_v51 = vpop.permute.xlu2 %880 }
 0xa9d   :  { %v883_v54 = vmul.f32 %v881_v51, %v855_v53 }
 0xa9f   :  { %885 = vrot.lane.b32.xlu1 %v883_v54, %s2013_s19 }
 0xab5   :  { %v892_v32 = vpop.permute.xlu0 %891 }
 0xab6   :  { %v894_v61 = vmul.f32 %v892_v32, %v874_v8 }
 0xab8   :  { %896 = vrot.lane.b32.xlu2 %v894_v61, %s2013_s19 }
 0xb11   :  { %v886_v11 = vpop.permute.xlu1 %885 }
 0xb12   :  { %v897_v13 = vpop.permute.xlu2 %896  ;;  %v2604_v56 = vadd.f32 %v886_v11, %v878_v9 }
 0xb13   :  { %v2606_v21 = vadd.f32 %v897_v13, %v889_v10 }
 0xb14   :  { %1857 = vtanh.f32 %v2604_v56 }
 0xb15   :  { %1859 = vtanh.f32 %v2606_v21 }
 0xb1a   :  { %v1858_v22 = vpop.eup %1857 }
 0xb1b   :  { %v1860_v25 = vpop.eup %1859  ;;  %902 = vrot.lane.b32.xlu0 %v1858_v22, %s2014_s30 }
 0xb1c   :  { %908 = vrot.lane.b32.xlu1 %v1860_v25, %s2014_s30 }
 0xb8d   :  { %v903_v26 = vpop.permute.xlu0 %902 }
 0xb8e   :  { %v909_v33 = vpop.permute.xlu1 %908  ;;  %v905_v27 = vmul.f32 %v903_v26, %v855_v53 }
 0xb8f   :  { %v911_v3 = vmul.f32 %v909_v33, %v874_v8 }
 0xb90   :  { %913 = vrot.lane.b32.xlu2 %v905_v27, %s2013_s19 }
 0xb91   :  { %917 = vrot.lane.b32.xlu0 %v911_v3, %s2014_s30 }
 0xbea   :  { %v914_v28 = vpop.permute.xlu2 %913 }
 0xc03   :  { %v918_v19 = vpop.permute.xlu0 %917 }
 0xc04   :  { %v920_v20 = vsel %vm58_vm0, %v914_v28, %v918_v19 }
 0xc05   :  { %1751 = vmatmul.msk.f32.vlgmr.msrb.gmra.mxu0 %vm238_vm1, %v920_v20  ;;  %1752 = vmatmul.msk.f32.vlgmr.msrb.gmra.mxu1 %vm238_vm1, %v920_v20 }
 0xc06   :  { %1452 = vmatpush.msrb.mxu0 %v2532_v14  ;;  %1472 = vmatpush.msrb.mxu1 %v2538_v15  ;;  %v1955_v14 = vld [vmem:[%s2811_s2 + $0x20] sm:$0xff]  ;;  %v1956_v15 = vld [vmem:[%s2811_s2 + $0x28] sm:$0xff] }
 0xc08   :  { %1453 = vmatpush.msrb.mxu0 %v2544_v16  ;;  %1473 = vmatpush.msrb.mxu1 %v2550_v17  ;;  %v1957_v16 = vld [vmem:[%s2811_s2 + $0x10] sm:$0xff]  ;;  %v1958_v17 = vld [vmem:[%s2811_s2 + $0x18] sm:$0xff] }
 0xc0a   :  { %1454 = vmatpush.msrb.mxu0 %v2556_v18  ;;  %1474 = vmatpush.msrb.mxu1 %v2562_v4  ;;  %v1959_v18 = vld [vmem:[%s2811_s2] sm:$0xff]  ;;  %v1960_v4 = vld [vmem:[%s2811_s2 + $0x8] sm:$0xff]  ;;  %s2015_s2 = smov 96  }
 0xc0c   :  { %1455 = vmatpush.msrb.mxu0 %v2568_v5  ;;  %1475 = vmatpush.msrb.mxu1 %v2574_v6  ;;  %v121_v5 = vpop.f32.mrf.mxu0 }
 0xc0d   :  { %v122_v30 = vadd.f32 %v121_v5, %v2384_v49 }
 0xc0e   :  { %1456 = vmatpush.msrb.mxu0 %v2580_v12  ;;  %1476 = vmatpush.msrb.mxu1 %v2586_v45 }
 0xc10   :  { %1457 = vmatpush.msrb.mxu0 %v1955_v14  ;;  %1477 = vmatpush.msrb.mxu1 %v1956_v15 }
 0xc12   :  { %1458 = vmatpush.msrb.mxu0 %v1957_v16  ;;  %1478 = vmatpush.msrb.mxu1 %v1958_v17 }
 0xc14   :  { %1459 = vmatpush.msrb.mxu0 %v1959_v18  ;;  %1479 = vmatpush.msrb.mxu1 %v1960_v4  ;;  %v2645_v6 = vpop.f32.mrf.mxu0 }
 0xc1c   :  { %v2647_v12 = vpop.f32.mrf.mxu0 }
 0xc24   :  { %v2649_v45 = vpop.f32.mrf.mxu0 }
 0xc2c   :  { %v2651_v23 = vpop.f32.mrf.mxu0 }
 0xc82   :  { %v941_v31 = vpop.f32.mrf.mxu0  ;;  %v961_v29 = vpop.f32.mrf.mxu1 }
 0xc83   :  { %v965_v34 = vadd.f32 %v941_v31, %v122_v30  ;;  %v967_v44 = vadd.f32 %v961_v29, %v166_v24  ;;  %v163_v24 = vadd.f32 %v2369_v42, %v2386_v52  ;;  %v125_v30 = vadd.f32 %v2645_v6, %v2384_v49 }
 0xc85   :  { %1861 = vtanh.f32 %v965_v34  ;;  %v1754_v59 = vmul.f32 -1.442695, %v967_v44  ;;  %v1753_v47 = vmul.f32 -1.442695, %v965_v34 }
 0xc86   :  { %1863 = vtanh.f32 %v967_v44 }
 0xc87   :  { %1865 = vpow2.f32 %v1754_v59 }
 0xc8b   :  { %v1862_v35 = vpop.eup %1861 }
 0xc8c   :  { %v1864_v36 = vpop.eup %1863  ;;  %1010 = vrot.lane.b32.xlu1 %v1862_v35, %s2014_s30 }
 0xc8d   :  { %1021 = vrot.lane.b32.xlu2 %v1864_v36, %s2014_s30  ;;  %v1866_v37 = vpop.eup %1865 }
 0xc8e   :  { %v990_v63 = vadd.f32 1.0, %v1866_v37 }
 0xc90   :  { %1867 = vrcp.f32 %v990_v63  ;;  %v1002_v55 = vand.u32 2147483648, %v990_v63  ;;  %vm996_vm15 = vweird.f32 %v990_v63  ;;  %v1000_v57 = vand.u32 2147483647, %v990_v63 }
 0xc91   :  { %1869 = vpow2.f32 %v1753_v47 }
 0xc92   :  { %v1003_v60 = vor.u32 1.1754944e-38, %v1002_v55  ;;  %vm1001_vm3 = vcmp.eq.f32.partialorder %v1000_v57, 8.507059e+37 }
 0xc96   :  { %v1868_v43 = vpop.eup %1867 }
 0xc97   :  { %v992_v38 = vmul.f32 %v1868_v43, %v990_v63  ;;  %v1870_v50 = vpop.eup %1869  ;;  %vm997_vm14 = vweird.f32 %v1868_v43 }
 0xc98   :  { %v971_v53 = vadd.f32 1.0, %v1870_v50  ;;  %vm998_vm2 = vmor %vm996_vm15, %vm997_vm14 }
 0xc99   :  { %v993_v48 = vsub.f32 1.0, %v992_v38 }
 0xc9a   :  { %1871 = vrcp.f32 %v971_v53  ;;  %v983_v9 = vand.u32 2147483648, %v971_v53  ;;  %vm977_vm5 = vweird.f32 %v971_v53  ;;  %v981_v10 = vand.u32 2147483647, %v971_v53 }
 0xc9b   :  { %v994_v51 = vmul.f32 %v1868_v43, %v993_v48 }
 0xc9c   :  { %v984_v13 = vor.u32 1.1754944e-38, %v983_v9  ;;  %vm982_vm7 = vcmp.eq.f32.partialorder %v981_v10, 8.507059e+37 }
 0xc9d   :  { %v995_v54 = vadd.f32 %v1868_v43, %v994_v51 }
 0xc9f   :  { %v999_v58 = vsel %vm998_vm2, %v1868_v43, %v995_v54 }
 0xca0   :  { %v1004_v0 = vsel %vm1001_vm3, %v1003_v60, %v999_v58  ;;  %v1872_v1 = vpop.eup %1871 }
 0xca1   :  { %v973_v46 = vmul.f32 %v1872_v1, %v971_v53  ;;  %vm978_vm4 = vweird.f32 %v1872_v1  ;;  %v1019_v33 = vmul.f32 %v1004_v0, %v2606_v21 }
 0xca2   :  { %vm979_vm6 = vmor %vm977_vm5, %vm978_vm4 }
 0xca3   :  { %v974_v32 = vsub.f32 1.0, %v973_v46 }
 0xca5   :  { %v975_v8 = vmul.f32 %v1872_v1, %v974_v32 }
 0xca7   :  { %v976_v61 = vadd.f32 %v1872_v1, %v975_v8 }
 0xca9   :  { %v980_v11 = vsel %vm979_vm6, %v1872_v1, %v976_v61 }
 0xcaa   :  { %v985_v25 = vsel %vm982_vm7, %v984_v13, %v980_v11 }
 0xcab   :  { %v1008_v19 = vmul.f32 %v985_v25, %v2604_v56 }
 0xce7   :  { %v1022_v62 = vpop.permute.xlu2 %1021 }
 0xce8   :  { %v1024_v2 = vmul.f32 %v1022_v62, %v1004_v0 }
 0xcea   :  { %1026 = vrot.lane.b32.xlu1 %v1024_v2, %s2013_s19 }
 0xcfe   :  { %v1011_v22 = vpop.permute.xlu1 %1010 }
 0xcff   :  { %v1013_v26 = vmul.f32 %v1011_v22, %v985_v25 }
 0xd01   :  { %1015 = vrot.lane.b32.xlu0 %v1013_v26, %s2013_s19 }
 0xd5c   :  { %v1027_v27 = vpop.permute.xlu1 %1026 }
 0xd5d   :  { %v2661_v3 = vadd.f32 %v1027_v27, %v1019_v33 }
 0xd5f   :  { %1873 = vtanh.f32 %v2661_v3 }
 0xd65   :  { %v1874_v28 = vpop.eup %1873 }
 0xd66   :  { %1038 = vrot.lane.b32.xlu0 %v1874_v28, %s2014_s30 }
 0xd73   :  { %v1016_v20 = vpop.permute.xlu0 %1015 }
 0xd74   :  { %v2666_v14 = vadd.f32 %v1016_v20, %v1008_v19 }
 0xd76   :  { %1875 = vtanh.f32 %v2666_v14 }
 0xd7c   :  { %v1876_v15 = vpop.eup %1875 }
 0xd7d   :  { %1032 = vrot.lane.b32.xlu2 %v1876_v15, %s2014_s30 }
 0xdd7   :  { %v1033_v16 = vpop.permute.xlu2 %1032 }
 0xdd8   :  { %v1039_v21 = vpop.permute.xlu0 %1038  ;;  %v1035_v17 = vmul.f32 %v1033_v16, %v985_v25 }
 0xdd9   :  { %v1041_v18 = vmul.f32 %v1039_v21, %v1004_v0 }
 0xdda   :  { %1043 = vrot.lane.b32.xlu1 %v1035_v17, %s2013_s19 }
 0xddb   :  { %1047 = vrot.lane.b32.xlu2 %v1041_v18, %s2014_s30 }
 0xe35   :  { %v1048_v4 = vpop.permute.xlu2 %1047 }
 0xe4c   :  { %v1044_v5 = vpop.permute.xlu1 %1043 }
 0xe4d   :  { %v1050_v56 = vsel %vm58_vm0, %v1044_v5, %v1048_v4  ;;  %v160_v5 = vadd.f32 %v2367_v41, %v2386_v52 }
 0xe4e   :  { %1755 = vmatmul.msk.f32.vlgmr.msrb.gmra.mxu2 %vm238_vm1, %v1050_v56  ;;  %1756 = vmatmul.msk.f32.vlgmr.msrb.gmra.mxu3 %vm238_vm1, %v1050_v56  ;;  %v128_v56 = vadd.f32 %v2647_v12, %v2384_v49 }
 0xed1   :  { %v1071_v31 = vpop.f32.mrf.mxu2  ;;  %v1091_v29 = vpop.f32.mrf.mxu3 }
 0xed2   :  { %v1095_v34 = vadd.f32 %v1071_v31, %v125_v30  ;;  %v1097_v44 = vadd.f32 %v1091_v29, %v163_v24 }
 0xed4   :  { %1877 = vtanh.f32 %v1095_v34  ;;  %v1757_v59 = vmul.f32 -1.442695, %v1095_v34  ;;  %v1758_v37 = vmul.f32 -1.442695, %v1097_v44 }
 0xed5   :  { %1879 = vtanh.f32 %v1097_v44 }
 0xed6   :  { %1881 = vpow2.f32 %v1757_v59 }
 0xed7   :  { %1883 = vpow2.f32 %v1758_v37 }
 0xeda   :  { %v1878_v35 = vpop.eup %1877 }
 0xedb   :  { %v1880_v36 = vpop.eup %1879  ;;  %1140 = vrot.lane.b32.xlu0 %v1878_v35, %s2014_s30 }
 0xedc   :  { %1151 = vrot.lane.b32.xlu1 %v1880_v36, %s2014_s30  ;;  %v1882_v42 = vpop.eup %1881 }
 0xedd   :  { %v1884_v63 = vpop.eup %1883  ;;  %v1101_v43 = vadd.f32 1.0, %v1882_v42 }
 0xede   :  { %v1120_v6 = vadd.f32 1.0, %v1884_v63 }
 0xedf   :  { %1885 = vrcp.f32 %v1101_v43  ;;  %v1113_v60 = vand.u32 2147483648, %v1101_v43  ;;  %vm1107_vm10 = vweird.f32 %v1101_v43  ;;  %v1111_v0 = vand.u32 2147483647, %v1101_v43 }
 0xee0   :  { %1887 = vrcp.f32 %v1120_v6  ;;  %v1132_v62 = vand.u32 2147483648, %v1120_v6  ;;  %vm1126_vm11 = vweird.f32 %v1120_v6  ;;  %v1130_v1 = vand.u32 2147483647, %v1120_v6 }
 0xee1   :  { %v1114_v32 = vor.u32 1.1754944e-38, %v1113_v60  ;;  %vm1112_vm14 = vcmp.eq.f32.partialorder %v1111_v0, 8.507059e+37 }
 0xee2   :  { %v1133_v8 = vor.u32 1.1754944e-38, %v1132_v62  ;;  %vm1131_vm15 = vcmp.eq.f32.partialorder %v1130_v1, 8.507059e+37 }
 0xee5   :  { %v1886_v47 = vpop.eup %1885 }
 0xee6   :  { %v1888_v38 = vpop.eup %1887  ;;  %v1103_v48 = vmul.f32 %v1886_v47, %v1101_v43  ;;  %vm1108_vm8 = vweird.f32 %v1886_v47 }
 0xee7   :  { %v1122_v50 = vmul.f32 %v1888_v38, %v1120_v6  ;;  %vm1127_vm9 = vweird.f32 %v1888_v38  ;;  %vm1109_vm12 = vmor %vm1107_vm10, %vm1108_vm8 }
 0xee8   :  { %v1104_v51 = vsub.f32 1.0, %v1103_v48  ;;  %vm1128_vm13 = vmor %vm1126_vm11, %vm1127_vm9 }
 0xee9   :  { %v1123_v53 = vsub.f32 1.0, %v1122_v50 }
 0xeea   :  { %v1105_v54 = vmul.f32 %v1886_v47, %v1104_v51 }
 0xeeb   :  { %v1124_v55 = vmul.f32 %v1888_v38, %v1123_v53 }
 0xeec   :  { %v1106_v57 = vadd.f32 %v1886_v47, %v1105_v54 }
 0xeed   :  { %v1125_v58 = vadd.f32 %v1888_v38, %v1124_v55 }
 0xeee   :  { %v1110_v2 = vsel %vm1109_vm12, %v1886_v47, %v1106_v57 }
 0xeef   :  { %v1129_v46 = vsel %vm1128_vm13, %v1888_v38, %v1125_v58  ;;  %v1115_v9 = vsel %vm1112_vm14, %v1114_v32, %v1110_v2 }
 0xef0   :  { %v1134_v11 = vsel %vm1131_vm15, %v1133_v8, %v1129_v46  ;;  %v1138_v25 = vmul.f32 %v1115_v9, %v2666_v14 }
 0xef1   :  { %v1149_v28 = vmul.f32 %v1134_v11, %v2661_v3 }
 0xf4d   :  { %v1141_v61 = vpop.permute.xlu0 %1140 }
 0xf4e   :  { %v1152_v10 = vpop.permute.xlu1 %1151  ;;  %v1143_v13 = vmul.f32 %v1141_v61, %v1115_v9 }
 0xf4f   :  { %v1154_v22 = vmul.f32 %v1152_v10, %v1134_v11 }
 0xf50   :  { %1145 = vrot.lane.b32.xlu2 %v1143_v13, %s2013_s19 }
 0xf51   :  { %1156 = vrot.lane.b32.xlu0 %v1154_v22, %s2013_s19 }
 0xfaa   :  { %v1146_v26 = vpop.permute.xlu2 %1145 }
 0xfab   :  { %v2684_v33 = vadd.f32 %v1146_v26, %v1138_v25 }
 0xfad   :  { %1889 = vtanh.f32 %v2684_v33 }
 0xfb3   :  { %v1890_v27 = vpop.eup %1889 }
 0xfb4   :  { %1162 = vrot.lane.b32.xlu1 %v1890_v27, %s2014_s30 }
 0xfc3   :  { %v1157_v19 = vpop.permute.xlu0 %1156 }
 0xfc4   :  { %v2689_v20 = vadd.f32 %v1157_v19, %v1149_v28 }
 0xfc6   :  { %1891 = vtanh.f32 %v2689_v20 }
 0xfcc   :  { %v1892_v15 = vpop.eup %1891 }
 0xfcd   :  { %1168 = vrot.lane.b32.xlu2 %v1892_v15, %s2014_s30 }
0x1026   :  { %v1163_v16 = vpop.permute.xlu1 %1162 }
0x1027   :  { %v1169_v14 = vpop.permute.xlu2 %1168  ;;  %v1165_v21 = vmul.f32 %v1163_v16, %v1115_v9 }
0x1028   :  { %v1171_v17 = vmul.f32 %v1169_v14, %v1134_v11 }
0x1029   :  { %1173 = vrot.lane.b32.xlu0 %v1165_v21, %s2013_s19 }
0x102a   :  { %1177 = vrot.lane.b32.xlu1 %v1171_v17, %s2014_s30  ;;  %v157_v17 = vadd.f32 %v2365_v40, %v2386_v52 }
0x109b   :  { %v1174_v18 = vpop.permute.xlu0 %1173 }
0x109c   :  { %v1178_v4 = vpop.permute.xlu1 %1177 }
0x109d   :  { %v1180_v3 = vsel %vm58_vm0, %v1174_v18, %v1178_v4  ;;  %v131_v18 = vadd.f32 %v2649_v45, %v2384_v49 }
0x109e   :  { %1759 = vmatmul.msk.f32.vlgmr.msra.gmra.mxu0 %vm238_vm1, %v1180_v3  ;;  %1760 = vmatmul.msk.f32.vlgmr.msra.gmra.mxu1 %vm238_vm1, %v1180_v3 }
0x111b   :  { %v1201_v24 = vpop.f32.mrf.mxu0  ;;  %v1221_v30 = vpop.f32.mrf.mxu1 }
0x111c   :  { %v1225_v31 = vadd.f32 %v1201_v24, %v128_v56  ;;  %v1227_v29 = vadd.f32 %v1221_v30, %v160_v5 }
0x111e   :  { %1893 = vtanh.f32 %v1225_v31  ;;  %v1761_v35 = vmul.f32 -1.442695, %v1225_v31  ;;  %v1762_v37 = vmul.f32 -1.442695, %v1227_v29 }
0x111f   :  { %1895 = vtanh.f32 %v1227_v29 }
0x1120   :  { %1897 = vpow2.f32 %v1761_v35 }
0x1124   :  { %v1894_v34 = vpop.eup %1893 }
0x1125   :  { %v1896_v44 = vpop.eup %1895  ;;  %1270 = vrot.lane.b32.xlu2 %v1894_v34, %s2014_s30 }
0x1126   :  { %1281 = vrot.lane.b32.xlu0 %v1896_v44, %s2014_s30  ;;  %v1898_v36 = vpop.eup %1897 }
0x1127   :  { %v1231_v59 = vadd.f32 1.0, %v1898_v36 }
0x1129   :  { %1899 = vrcp.f32 %v1231_v59  ;;  %v1243_v38 = vand.u32 2147483648, %v1231_v59  ;;  %vm1237_vm3 = vweird.f32 %v1231_v59  ;;  %v1241_v48 = vand.u32 2147483647, %v1231_v59 }
0x112a   :  { %1901 = vpow2.f32 %v1762_v37 }
0x112b   :  { %v1244_v51 = vor.u32 1.1754944e-38, %v1243_v38  ;;  %vm1242_vm5 = vcmp.eq.f32.partialorder %v1241_v48, 8.507059e+37 }
0x112f   :  { %v1900_v41 = vpop.eup %1899 }
0x1130   :  { %v1233_v12 = vmul.f32 %v1900_v41, %v1231_v59  ;;  %v1902_v43 = vpop.eup %1901  ;;  %vm1238_vm2 = vweird.f32 %v1900_v41 }
0x1131   :  { %v1250_v6 = vadd.f32 1.0, %v1902_v43  ;;  %vm1239_vm4 = vmor %vm1237_vm3, %vm1238_vm2 }
0x1132   :  { %v1234_v42 = vsub.f32 1.0, %v1233_v12 }
0x1133   :  { %1903 = vrcp.f32 %v1250_v6  ;;  %v1262_v1 = vand.u32 2147483648, %v1250_v6  ;;  %vm1256_vm7 = vweird.f32 %v1250_v6  ;;  %v1260_v2 = vand.u32 2147483647, %v1250_v6 }
0x1134   :  { %v1235_v63 = vmul.f32 %v1900_v41, %v1234_v42 }
0x1135   :  { %v1263_v32 = vor.u32 1.1754944e-38, %v1262_v1  ;;  %vm1261_vm9 = vcmp.eq.f32.partialorder %v1260_v2, 8.507059e+37 }
0x1136   :  { %v1236_v47 = vadd.f32 %v1900_v41, %v1235_v63 }
0x1138   :  { %v1240_v50 = vsel %vm1239_vm4, %v1900_v41, %v1236_v47 }
0x1139   :  { %v1245_v54 = vsel %vm1242_vm5, %v1244_v51, %v1240_v50  ;;  %v1904_v57 = vpop.eup %1903 }
0x113a   :  { %v1252_v58 = vmul.f32 %v1904_v57, %v1250_v6  ;;  %vm1257_vm6 = vweird.f32 %v1904_v57  ;;  %v1268_v10 = vmul.f32 %v1245_v54, %v2684_v33 }
0x113b   :  { %vm1258_vm8 = vmor %vm1256_vm7, %vm1257_vm6 }
0x113c   :  { %v1253_v60 = vsub.f32 1.0, %v1252_v58 }
0x113e   :  { %v1254_v62 = vmul.f32 %v1904_v57, %v1253_v60 }
0x1140   :  { %v1255_v0 = vadd.f32 %v1904_v57, %v1254_v62 }
0x1142   :  { %v1259_v46 = vsel %vm1258_vm8, %v1904_v57, %v1255_v0 }
0x1143   :  { %v1264_v61 = vsel %vm1261_vm9, %v1263_v32, %v1259_v46 }
0x1144   :  { %v1279_v11 = vmul.f32 %v1264_v61, %v2689_v20 }
0x117f   :  { %v1271_v53 = vpop.permute.xlu2 %1270 }
0x1180   :  { %v1273_v55 = vmul.f32 %v1271_v53, %v1245_v54 }
0x1182   :  { %1275 = vrot.lane.b32.xlu1 %v1273_v55, %s2013_s19 }
0x1198   :  { %v1282_v8 = vpop.permute.xlu0 %1281 }
0x1199   :  { %v1284_v9 = vmul.f32 %v1282_v8, %v1264_v61 }
0x119b   :  { %1286 = vrot.lane.b32.xlu2 %v1284_v9, %s2013_s19 }
0x11f4   :  { %v1276_v13 = vpop.permute.xlu1 %1275 }
0x11f5   :  { %v1287_v22 = vpop.permute.xlu2 %1286  ;;  %v2708_v25 = vadd.f32 %v1276_v13, %v1268_v10 }
0x11f6   :  { %v2710_v26 = vadd.f32 %v1287_v22, %v1279_v11 }
0x11f7   :  { %1905 = vtanh.f32 %v2708_v25 }
0x11f8   :  { %1907 = vtanh.f32 %v2710_v26 }
0x11fd   :  { %v1906_v27 = vpop.eup %1905 }
0x11fe   :  { %v1908_v28 = vpop.eup %1907  ;;  %1292 = vrot.lane.b32.xlu0 %v1906_v27, %s2014_s30 }
0x11ff   :  { %1298 = vrot.lane.b32.xlu1 %v1908_v28, %s2014_s30 }
0x1270   :  { %v1293_v19 = vpop.permute.xlu0 %1292 }
0x1271   :  { %v1299_v33 = vpop.permute.xlu1 %1298  ;;  %v1295_v15 = vmul.f32 %v1293_v19, %v1245_v54 }
0x1272   :  { %v1301_v20 = vmul.f32 %v1299_v33, %v1264_v61  ;;  %v154_v33 = vadd.f32 %v2359_v39, %v2386_v52 }
0x1273   :  { %1303 = vrot.lane.b32.xlu2 %v1295_v15, %s2013_s19  ;;  %v134_v15 = vadd.f32 %v2651_v23, %v2384_v49 }
0x1274   :  { %1307 = vrot.lane.b32.xlu0 %v1301_v20, %s2014_s30 }
0x12cd   :  { %v1304_v16 = vpop.permute.xlu2 %1303 }
0x12e6   :  { %v1308_v14 = vpop.permute.xlu0 %1307 }
0x12e7   :  { %v1310_v21 = vsel %vm58_vm0, %v1304_v16, %v1308_v14 }
0x12e8   :  { %1763 = vmatmul.msk.f32.vlgmr.msra.gmra.mxu2 %vm238_vm1, %v1310_v21  ;;  %1764 = vmatmul.msk.f32.vlgmr.msra.gmra.mxu3 %vm238_vm1, %v1310_v21 }
0x136b   :  { %v1331_v4 = vpop.f32.mrf.mxu2  ;;  %v1351_v3 = vpop.f32.mrf.mxu3 }
0x136c   :  { %v1355_v5 = vadd.f32 %v1331_v4, %v131_v18  ;;  %v1357_v56 = vadd.f32 %v1351_v3, %v157_v17 }
0x136e   :  { %1909 = vtanh.f32 %v1355_v5  ;;  %v1766_v31 = vmul.f32 -1.442695, %v1357_v56  ;;  %v1765_v44 = vmul.f32 -1.442695, %v1355_v5 }
0x136f   :  { %1911 = vtanh.f32 %v1357_v56 }
0x1370   :  { %1913 = vpow2.f32 %v1766_v31 }
0x1374   :  { %v1910_v24 = vpop.eup %1909 }
0x1375   :  { %v1912_v30 = vpop.eup %1911  ;;  %1400 = vrot.lane.b32.xlu1 %v1910_v24, %s2014_s30 }
0x1376   :  { %1411 = vrot.lane.b32.xlu2 %v1912_v30, %s2014_s30  ;;  %v1914_v29 = vpop.eup %1913 }
0x1377   :  { %v1380_v34 = vadd.f32 1.0, %v1914_v29 }
0x1379   :  { %1915 = vrcp.f32 %v1380_v34  ;;  %v1392_v12 = vand.u32 2147483648, %v1380_v34  ;;  %vm1386_vm11 = vweird.f32 %v1380_v34  ;;  %v1390_v42 = vand.u32 2147483647, %v1380_v34 }
0x137a   :  { %1917 = vpow2.f32 %v1765_v44 }
0x137b   :  { %v1393_v43 = vor.u32 1.1754944e-38, %v1392_v12  ;;  %vm1391_vm13 = vcmp.eq.f32.partialorder %v1390_v42, 8.507059e+37 }
0x137f   :  { %v1916_v40 = vpop.eup %1915 }
0x1380   :  { %v1382_v45 = vmul.f32 %v1916_v40, %v1380_v34  ;;  %v1918_v36 = vpop.eup %1917  ;;  %vm1387_vm10 = vweird.f32 %v1916_v40 }
0x1381   :  { %v1361_v41 = vadd.f32 1.0, %v1918_v36  ;;  %vm1388_vm12 = vmor %vm1386_vm11, %vm1387_vm10  ;;  %vm1629_vm11 = vcmask 31744  }
0x1382   :  { %v1383_v35 = vsub.f32 1.0, %v1382_v45 }
0x1383   :  { %1919 = vrcp.f32 %v1361_v41  ;;  %v1373_v55 = vand.u32 2147483648, %v1361_v41  ;;  %vm1367_vm15 = vweird.f32 %v1361_v41  ;;  %v1371_v57 = vand.u32 2147483647, %v1361_v41 }
0x1384   :  { %v1384_v59 = vmul.f32 %v1916_v40, %v1383_v35 }
0x1385   :  { %v1374_v60 = vor.u32 1.1754944e-38, %v1373_v55  ;;  %vm1372_vm3 = vcmp.eq.f32.partialorder %v1371_v57, 8.507059e+37 }
0x1386   :  { %v1385_v37 = vadd.f32 %v1916_v40, %v1384_v59 }
0x1388   :  { %v1389_v63 = vsel %vm1388_vm12, %v1916_v40, %v1385_v37 }
0x1389   :  { %v1394_v47 = vsel %vm1391_vm13, %v1393_v43, %v1389_v63  ;;  %v1920_v38 = vpop.eup %1919 }
0x138a   :  { %v1363_v50 = vmul.f32 %v1920_v38, %v1361_v41  ;;  %vm1368_vm14 = vweird.f32 %v1920_v38  ;;  %v1409_v2 = vmul.f32 %v1394_v47, %v2710_v26 }
0x138b   :  { %vm1369_vm2 = vmor %vm1367_vm15, %vm1368_vm14 }
0x138c   :  { %v1364_v51 = vsub.f32 1.0, %v1363_v50 }
0x138e   :  { %v1365_v53 = vmul.f32 %v1920_v38, %v1364_v51 }
0x1390   :  { %v1366_v54 = vadd.f32 %v1920_v38, %v1365_v53 }
0x1392   :  { %v1370_v58 = vsel %vm1369_vm2, %v1920_v38, %v1366_v54 }
0x1393   :  { %v1375_v0 = vsel %vm1372_vm3, %v1374_v60, %v1370_v58 }
0x1394   :  { %v1398_v61 = vmul.f32 %v1375_v0, %v2708_v25 }
0x13d0   :  { %v1412_v6 = vpop.permute.xlu2 %1411 }
0x13d1   :  { %v1414_v48 = vmul.f32 %v1412_v6, %v1394_v47 }
0x13d3   :  { %1416 = vrot.lane.b32.xlu1 %v1414_v48, %s2013_s19 }
0x13e7   :  { %v1401_v62 = vpop.permute.xlu1 %1400 }
0x13e8   :  { %v1403_v1 = vmul.f32 %v1401_v62, %v1375_v0 }
0x13ea   :  { %1405 = vrot.lane.b32.xlu0 %v1403_v1, %s2013_s19  ;;  %v225_v1 = vld [vmem:[%s2815_s6 + $0x30] sm:$0xff] }
0x1445   :  { %v1417_v46 = vpop.permute.xlu1 %1416 }
0x1446   :  { %v2730_v32 = vadd.f32 %v1417_v46, %v1409_v2  ;;  %v224_v2 = vld [vmem:[%s2815_s6 + $0x28] sm:$0xff]  ;;  %v223_v46 = vld [vmem:[%s2815_s6 + $0x20] sm:$0xff] }
0x1448   :  { %1921 = vtanh.f32 %v2730_v32 }
0x144e   :  { %v1922_v8 = vpop.eup %1921 }
0x144f   :  { %1428 = vrot.lane.b32.xlu0 %v1922_v8, %s2014_s30  ;;  %v220_v8 = vld [vmem:[%s2815_s6 + $0x8] sm:$0xff] }
0x145c   :  { %v1406_v9 = vpop.permute.xlu0 %1405 }
0x145d   :  { %v2735_v10 = vadd.f32 %v1406_v9, %v1398_v61  ;;  %v219_v61 = vld [vmem:[%s2815_s6] sm:$0xff] }
0x145f   :  { %1923 = vtanh.f32 %v2735_v10 }
0x1465   :  { %v1924_v11 = vpop.eup %1923 }
0x1466   :  { %1422 = vrot.lane.b32.xlu2 %v1924_v11, %s2014_s30 }
0x14c0   :  { %v1423_v13 = vpop.permute.xlu2 %1422 }
0x14c1   :  { %v1429_v22 = vpop.permute.xlu0 %1428  ;;  %v1425_v26 = vmul.f32 %v1423_v13, %v1375_v0  ;;  %v226_v0 = vld [vmem:[%s2815_s6 + $0x38] sm:$0xff] }
0x14c2   :  { %v1431_v27 = vmul.f32 %v1429_v22, %v1394_v47  ;;  %1593 = vmatpush.msrb.mxu2 %v226_v0 }
0x14c3   :  { %1433 = vrot.lane.b32.xlu1 %v1425_v26, %s2013_s19 }
0x14c4   :  { %1437 = vrot.lane.b32.xlu2 %v1431_v27, %s2014_s30  ;;  %1594 = vmatpush.msrb.mxu2 %v225_v1 }
0x14c6   :  { %1595 = vmatpush.msrb.mxu2 %v224_v2 }
0x14c8   :  { %1596 = vmatpush.msrb.mxu2 %v223_v46 }
0x151e   :  { %v1438_v28 = vpop.permute.xlu2 %1437 }
0x1535   :  { %v1434_v19 = vpop.permute.xlu1 %1433 }
0x1536   :  { %v1440_v25 = vsel %vm58_vm0, %v1434_v19, %v1438_v28 }
0x1537   :  { %1767 = vmatmul.msk.f32.vlgmr.msrb.gmra.mxu0 %vm238_vm1, %v1440_v25  ;;  %1768 = vmatmul.msk.f32.vlgmr.msrb.gmra.mxu1 %vm238_vm1, %v1440_v25 }
0x15b4   :  { %v1461_v20 = vpop.f32.mrf.mxu0  ;;  %v1481_v16 = vpop.f32.mrf.mxu1 }
0x15b5   :  { %v1488_v14 = vadd.f32 %v1461_v20, %v134_v15  ;;  %v1493_v21 = vadd.f32 %v1481_v16, %v154_v33  ;;  %v1780_v15 = vld [vmem:[%s2816_s7] ss:$0 sm:$0xff]  ;;  %s2017_s7 = smov 128  }
0x15b7   :  { %1925 = vtanh.f32 %v1488_v14  ;;  %v1769_v4 = vmul.f32 -1.442695, %v1488_v14  ;;  %v1770_v3 = vmul.f32 -1.442695, %v1493_v21 }
0x15b8   :  { %1927 = vtanh.f32 %v1493_v21 }
0x15b9   :  { %1929 = vpow2.f32 %v1769_v4 }
0x15ba   :  { %1931 = vpow2.f32 %v1770_v3 }
0x15bd   :  { %v1926_v17 = vpop.eup %1925 }
0x15be   :  { %v1928_v18 = vpop.eup %1927  ;;  %1536 = vrot.lane.b32.xlu0 %v1926_v17, %s2014_s30 }
0x15bf   :  { %1547 = vrot.lane.b32.xlu1 %v1928_v18, %s2014_s30  ;;  %v1930_v39 = vpop.eup %1929 }
0x15c0   :  { %v1932_v52 = vpop.eup %1931  ;;  %v1497_v5 = vadd.f32 1.0, %v1930_v39 }
0x15c1   :  { %v1516_v49 = vadd.f32 1.0, %v1932_v52 }
0x15c2   :  { %1933 = vrcp.f32 %v1497_v5  ;;  %v1509_v35 = vand.u32 2147483648, %v1497_v5  ;;  %vm1503_vm5 = vweird.f32 %v1497_v5  ;;  %v1507_v59 = vand.u32 2147483647, %v1497_v5 }
0x15c3   :  { %1935 = vrcp.f32 %v1516_v49  ;;  %v1528_v36 = vand.u32 2147483648, %v1516_v49  ;;  %vm1522_vm6 = vweird.f32 %v1516_v49  ;;  %v1526_v41 = vand.u32 2147483647, %v1516_v49 }
0x15c4   :  { %v1510_v42 = vor.u32 1.1754944e-38, %v1509_v35  ;;  %vm1508_vm9 = vcmp.eq.f32.partialorder %v1507_v59, 8.507059e+37 }
0x15c5   :  { %v1529_v63 = vor.u32 1.1754944e-38, %v1528_v36  ;;  %vm1527_vm10 = vcmp.eq.f32.partialorder %v1526_v41, 8.507059e+37 }
0x15c8   :  { %v1934_v23 = vpop.eup %1933 }
0x15c9   :  { %v1936_v56 = vpop.eup %1935  ;;  %v1499_v24 = vmul.f32 %v1934_v23, %v1497_v5  ;;  %vm1504_vm1 = vweird.f32 %v1934_v23 }
0x15ca   :  { %v1518_v30 = vmul.f32 %v1936_v56, %v1516_v49  ;;  %vm1523_vm4 = vweird.f32 %v1936_v56  ;;  %vm1505_vm7 = vmor %vm1503_vm5, %vm1504_vm1 }
0x15cb   :  { %v1500_v31 = vsub.f32 1.0, %v1499_v24  ;;  %vm1524_vm8 = vmor %vm1522_vm6, %vm1523_vm4 }
0x15cc   :  { %v1519_v29 = vsub.f32 1.0, %v1518_v30 }
0x15cd   :  { %v1501_v34 = vmul.f32 %v1934_v23, %v1500_v31 }
0x15ce   :  { %v1520_v40 = vmul.f32 %v1936_v56, %v1519_v29 }
0x15cf   :  { %v1502_v44 = vadd.f32 %v1934_v23, %v1501_v34 }
0x15d0   :  { %v1521_v45 = vadd.f32 %v1936_v56, %v1520_v40 }
0x15d1   :  { %v1506_v37 = vsel %vm1505_vm7, %v1934_v23, %v1502_v44 }
0x15d2   :  { %v1525_v12 = vsel %vm1524_vm8, %v1936_v56, %v1521_v45  ;;  %v1511_v6 = vsel %vm1508_vm9, %v1510_v42, %v1506_v37 }
0x15d3   :  { %v1530_v38 = vsel %vm1527_vm10, %v1529_v63, %v1525_v12  ;;  %v1534_v51 = vmul.f32 %v1511_v6, %v2735_v10 }
0x15d4   :  { %v1545_v57 = vmul.f32 %v1530_v38, %v2730_v32  ;;  %v221_v32 = vld [vmem:[%s2815_s6 + $0x10] sm:$0xff] }
0x1630   :  { %v1537_v43 = vpop.permute.xlu0 %1536 }
0x1631   :  { %v1548_v47 = vpop.permute.xlu1 %1547  ;;  %v1539_v48 = vmul.f32 %v1537_v43, %v1511_v6 }
0x1632   :  { %v1550_v50 = vmul.f32 %v1548_v47, %v1530_v38 }
0x1633   :  { %1541 = vrot.lane.b32.xlu2 %v1539_v48, %s2013_s19 }
0x1634   :  { %1552 = vrot.lane.b32.xlu0 %v1550_v50, %s2013_s19 }
0x168d   :  { %v1542_v53 = vpop.permute.xlu2 %1541 }
0x168e   :  { %v1544_v54 = vadd.f32 %v1542_v53, %v1534_v51 }
0x1690   :  { %1937 = vtanh.f32 %v1544_v54 }
0x1696   :  { %v1938_v55 = vpop.eup %1937 }
0x1697   :  { %1558 = vrot.lane.b32.xlu1 %v1938_v55, %s2014_s30 }
0x16a6   :  { %v1553_v58 = vpop.permute.xlu0 %1552 }
0x16a7   :  { %v1555_v60 = vadd.f32 %v1553_v58, %v1545_v57 }
0x16a9   :  { %1939 = vtanh.f32 %v1555_v60 }
0x16af   :  { %v1940_v62 = vpop.eup %1939 }
0x16b0   :  { %1564 = vrot.lane.b32.xlu2 %v1940_v62, %s2014_s30 }
0x16b8   :  { %1577 = vrot.lane.b32.xlu2 %v2409_v7, %s2015_s2  ;;  %v222_v7 = vld [vmem:[%s2815_s6 + $0x18] sm:$0xff] }
0x16b9   :  { %1616 = vmatpush.msrb.mxu3 %v222_v7 }
0x16bb   :  { %1617 = vmatpush.msrb.mxu3 %v221_v32 }
0x16bd   :  { %1618 = vmatpush.msrb.mxu3 %v220_v8 }
0x16bf   :  { %1619 = vmatpush.msrb.mxu3 %v219_v61 }
0x1709   :  { %v1559_v9 = vpop.permute.xlu1 %1558 }
0x170a   :  { %v1565_v10 = vpop.permute.xlu2 %1564  ;;  %v1561_v11 = vmul.f32 %v1559_v9, %v1511_v6 }
0x170b   :  { %v1567_v13 = vmul.f32 %v1565_v10, %v1530_v38 }
0x170c   :  { %1569 = vrot.lane.b32.xlu0 %v1561_v11, %s2013_s19 }
0x170d   :  { %1573 = vrot.lane.b32.xlu1 %v1567_v13, %s2014_s30  ;;  %s2016_s30 = smov [#allocation3]  }
0x170e   :  { %s1666_s13 = sshll.u32 %s2016_s30, 4  ;;  %s1667_s13 = int_to_ptr.vmem [resolvable:$true] %s1666_s13 }
0x1712   :  { %v1578_v22 = vpop.permute.xlu2 %1577 }
0x1713   :  { %1771 = vmatmul.msk.f32.vlgmr.msrb.gmra.mxu2 %vm58_vm0, %v1578_v22 }
0x177e   :  { %v1570_v26 = vpop.permute.xlu0 %1569 }
0x177f   :  { %v1574_v27 = vpop.permute.xlu1 %1573 }
0x1780   :  { %v1576_v28 = vsel %vm58_vm0, %v1570_v26, %v1574_v27 }
0x1781   :  { %1644 = vrot.lane.b32.xlu2 %v1576_v28, %s2015_s2  ;;  %1643 = vst.msk [vmem:[#allocation3] sm:$0xff] %vm58_vm0, %v1576_v28  ;;  %1772 = vmatmul.msk.f32.vlgmr.msrb.gmra.mxu3 %vm58_vm0, %v1576_v28 }
0x1789   :  { %1650 = vrot.lane.b32.xlu2 %v1544_v54, %s2015_s2 }
0x1791   :  { %1655 = vrot.lane.b32.xlu2 %v1555_v60, %s2015_s2 }
0x1796   :  { %v1598_v20 = vpop.f32.mrf.mxu2 }
0x17db   :  { %v1645_v19 = vpop.permute.xlu2 %1644 }
0x17dc   :  { %1648 = vst.msk [vmem:[#allocation3 + $0x8] sm:$0xff] %vm58_vm0, %v1645_v19 }
0x17dd   :  { %1674 = dma.vmem_to_hbm [thread:$0]  %s1667_s13, 256, %s1669_s16, [#allocation4], %s2017_s7, %s2017_s7, %s2018_s17  }
0x17e3   :  { %v1651_v25 = vpop.permute.xlu2 %1650 }
0x17e4   :  { %1653 = vst.msk [vmem:[#allocation5] sm:$0xff] %vm58_vm0, %v1651_v25 }
0x17eb   :  { %v1656_v33 = vpop.permute.xlu2 %1655 }
0x17ec   :  { %1659 = vst.msk [vmem:[#allocation5 + $0x8] sm:$0xff] %vm58_vm0, %v1656_v33 }
0x17ed   :  { %1687 = dma.vmem_to_hbm [thread:$0]  %s1680_s20, 256, %s1682_s22, [#allocation6], %s2017_s7, %s2017_s7, %s2018_s17  }
0x1804   :  { %v1621_v16 = vpop.f32.mrf.mxu3 }
0x1805   :  { %v1622_v14 = vadd.f32 %v1621_v16, %v1598_v20 }
0x1807   :  { %v1628_v21 = vadd.f32 %v1780_v15, %v1622_v14 }
0x1809   :  { %v1630_v17 = vsel %vm1629_vm11, %v1628_v21, -inf }
0x180a   :  { %1631 = vmax.xlane.f32.xlu0 %v1630_v17 }
0x187d   :  { %v1632_v18 = vpop.xlane.xlu0 %1631 }
0x187e   :  { %v1633_v4 = vsub.f32 %v1628_v21, %v1632_v18 }
0x1880   :  { %v1634_v3 = vmul.f32 1.442695, %v1633_v4 }
0x1882   :  { %1941 = vpow2.f32 %v1634_v3 }
0x1888   :  { %v1942_v39 = vpop.eup %1941 }
0x1889   :  { %v1636_v52 = vsel %vm1629_vm11, %v1942_v39, 0.0 }
0x188a   :  { %1637 = vadd.xlane.f32.xlu1 %v1636_v52 }
0x18fd   :  { %v1638_v5 = vpop.xlane.xlu1 %1637 }
0x18fe   :  { %1943 = vlog2.f32 %v1638_v5 }
0x1904   :  { %v1944_v49 = vpop.eup %1943 }
0x1905   :  { %v1640_v23 = vmul.f32 0.6931472, %v1944_v49 }
0x1907   :  { %v1641_v56 = vsub.f32 %v1633_v4, %v1640_v23 }
0x1909   :  { %1642 = vst.msk [vmem:[%s2817_s8] sm:$0xff] %vm1629_vm11, %v1641_v56 }
0x190a   :  { %2009 = dma.done.wait [#allocation4], 256  }
0x190b   :  { %2010 = vsyncadd [#allocation4], 4294967040 }
0x190c   :  { %2011 = dma.done.wait [#allocation6], 256  }
0x190d   :  { %2012 = vsyncadd [#allocation6], 4294967040 }
0x190e   :  { %1698 = vsyncpa [#allocation4], 1 }
0x190f   :  { %1699 = vsyncpa [#allocation6], 1 }

</bundles_post_ra>
